<compile_context>
chip_gen: v6e
topology: v6e:2x2x1
jax: 0.10.0
libtpu: 0.0.40
codegen_flags: <defaults>
</compile_context>

<pallas_src>
import functools

import jax
import jax.numpy as jnp
from jax import lax
from jax.experimental import pallas as pl
from jax.experimental.pallas import tpu as pltpu

HIDDEN_DIM = 256  # hard-coded inside MultiheadAttention.__init__


# ----------------------------------------------------------------------------
# Single fused kernel: projections -> multi-head attention -> out_linear ->
# NaN-zero -> linear1/relu/linear2.
# ----------------------------------------------------------------------------
def _fused_layer_kernel(
    q_in_ref, k_in_ref, v_in_ref,
    qw1_ref, qb1_ref, qw2_ref, qb2_ref,
    kw1_ref, kb1_ref, kw2_ref, kb2_ref,
    vw1_ref, vb1_ref, vw2_ref, vb2_ref,
    ow_ref, ob_ref, f1w_ref, f1b_ref, f2w_ref, f2b_ref,
    o_ref,
    qp_ref, kp_ref, vp_ref,
    *, T, S, B, nhead, dq, dk, dv):
  bf = jnp.bfloat16

  def mlp(x_ref, w1_ref, b1_ref, w2_ref, b2_ref):
    # bf16 MXU operands, f32 accumulation.
    x = x_ref[...].astype(bf)
    h = jnp.dot(x, w1_ref[...], preferred_element_type=jnp.float32) + b1_ref[...]
    h = jnp.maximum(h, 0.0).astype(bf)
    return jnp.dot(h, w2_ref[...], preferred_element_type=jnp.float32) + b2_ref[...]

  # Projection MLPs on the full (L*B, .) slabs (maximal matmul M); results stay
  # on-chip in f32 VMEM scratch -- never round-tripped through HBM.
  qp_ref[...] = mlp(q_in_ref, qw1_ref, qb1_ref, qw2_ref, qb2_ref)   # (T*B, nhead*dq)
  kp_ref[...] = mlp(k_in_ref, kw1_ref, kb1_ref, kw2_ref, kb2_ref)   # (S*B, nhead*dk)
  vp_ref[...] = mlp(v_in_ref, vw1_ref, vb1_ref, vw2_ref, vb2_ref)   # (S*B, nhead*dv)

  # TODO(synk): for long sequences / large batch add a KV-block grid axis with
  # online softmax (v7x 64 MiB VMEM) and a batch grid axis for megacore; the
  # small DeepMVI shapes fit comfortably in a single fused step.
  for b in range(B):                       # static unroll; B is small
    # rows of batch b live at {l*B + b}: strided sublane reads, no transpose.
    q_b = qp_ref[pl.ds(b, T, stride=B)].astype(bf)    # (T, nhead*dq)
    k_b = kp_ref[pl.ds(b, S, stride=B)].astype(bf)    # (S, nhead*dk)
    v_b = vp_ref[pl.ds(b, S, stride=B)].astype(bf)    # (S, nhead*dv)

    head_outs = []
    for h in range(nhead):                 # static unroll; nhead is small
      qh = q_b[:, h * dq:(h + 1) * dq]     # (T, dq)
      kh = k_b[:, h * dk:(h + 1) * dk]     # (S, dk)
      vh = v_b[:, h * dv:(h + 1) * dv]     # (S, dv)
      # q @ k^T as a trans-B contraction (no materialized transpose).
      s = lax.dot_general(qh, kh, (((1,), (1,)), ((), ())),
                          preferred_element_type=jnp.float32)        # (T, S)
      m = jnp.max(s, axis=-1, keepdims=True)
      e = jnp.exp(s - m)
      # Flash-style: un-normalized PV first, then scale the small (T, dv)
      # result by the EUP approximate reciprocal of the row sums.
      pv = lax.dot_general(e.astype(bf), vh, (((1,), (0,)), ((), ())),
                           preferred_element_type=jnp.float32)       # (T, dv)
      a = pv * pl.reciprocal(jnp.sum(e, axis=-1, keepdims=True), approx=True)
      # TODO(synk): dropout on the attention weights is inference-mode identity.
      head_outs.append(a.astype(bf))

    # Concatenate heads along lanes -> single K = nhead*dv out_linear matmul.
    a_cat = jnp.concatenate(head_outs, axis=-1)                      # (T, nhead*dv)
    src = jnp.dot(a_cat, ow_ref[...], preferred_element_type=jnp.float32) + ob_ref[...]
    src = jnp.where(jnp.isnan(src), 0.0, src)                        # src[isnan] = 0
    ff = jnp.maximum(
        jnp.dot(src.astype(bf), f1w_ref[...],
                preferred_element_type=jnp.float32) + f1b_ref[...], 0.0)
    out_b = jnp.dot(ff.astype(bf), f2w_ref[...],
                    preferred_element_type=jnp.float32) + f2b_ref[...]   # (T, dv)
    # (T, B, dv) row-major == (T, B*dv): contiguous lane-offset store per batch.
    o_ref[:, pl.ds(b * dv, dv)] = out_b.astype(o_ref.dtype)


# ----------------------------------------------------------------------------
# Wrapper: AttentionLayer.forward (src_mask=None path).  self_attn2 / norm are
# unused in the original forward, so they are not materialized.
# ----------------------------------------------------------------------------
def attention_layer_forward(params, query, key, value):
  T, B, dq = query.shape
  S = key.shape[0]
  nhead = params["nhead"]
  dk = params["d_key"]
  dv = params["d_value"]
  scaling = float(dq) ** (-0.5)
  bf = jnp.bfloat16

  qw1, qb1, qw2, qb2 = params["q_proj"]
  kw1, kb1, kw2, kb2 = params["k_proj"]
  vw1, vb1, vw2, vb2 = params["v_proj"]
  ow, ob = params["out"]
  f1w, f1b = params["ff1"]
  f2w, f2b = params["ff2"]

  # fold `query *= scaling` into the second q-projection layer (no extra pass)
  qw2s = (qw2 * scaling).astype(bf)
  qb2s = qb2 * scaling

  # (L, B, d) -> (L*B, d) is a free row-major reshape (rows ordered (t, b)).
  args = (
      query.reshape(T * B, dq), key.reshape(S * B, dk), value.reshape(S * B, dv),
      qw1.astype(bf), qb1, qw2s, qb2s,
      kw1.astype(bf), kb1, kw2.astype(bf), kb2,
      vw1.astype(bf), vb1, vw2.astype(bf), vb2,
      ow.astype(bf), ob, f1w.astype(bf), f1b, f2w.astype(bf), f2b,
  )
  in_specs = [pl.BlockSpec(a.shape, lambda i: (0, 0)) for a in args]

  dff = f1w.shape[1]
  flops = 2 * (
      T * B * (dq * HIDDEN_DIM + HIDDEN_DIM * nhead * dq)
      + S * B * (dk * HIDDEN_DIM + HIDDEN_DIM * nhead * dk)
      + S * B * (dv * HIDDEN_DIM + HIDDEN_DIM * nhead * dv)
      + B * nhead * T * S * (dq + dv)
      + T * B * (nhead * dv * dv + 2 * dv * dff))
  w_bytes = sum(int(a.size) * a.dtype.itemsize for a in args[3:])
  bytes_accessed = 4 * (T * B * dq + S * B * (dk + dv) + T * B * dv) + w_bytes
  cost = pl.CostEstimate(flops=int(flops), transcendentals=int(B * nhead * T * S),
                         bytes_accessed=int(bytes_accessed))

  kernel = functools.partial(_fused_layer_kernel, T=T, S=S, B=B, nhead=nhead,
                             dq=dq, dk=dk, dv=dv)
  out2d = pl.pallas_call(
      kernel,
      out_shape=jax.ShapeDtypeStruct((T, B * dv), jnp.float32),
      grid=(1,),
      in_specs=in_specs,
      out_specs=pl.BlockSpec((T, B * dv), lambda i: (0, 0)),
      scratch_shapes=[
          pltpu.VMEM((T * B, nhead * dq), jnp.float32),
          pltpu.VMEM((S * B, nhead * dk), jnp.float32),
          pltpu.VMEM((S * B, nhead * dv), jnp.float32),
      ],
      compiler_params=pltpu.CompilerParams(
          dimension_semantics=("arbitrary",),
          vmem_limit_bytes=32 * 1024 * 1024),
      cost_estimate=cost,
  )(*args)
  return out2d.reshape(T, B, dv)          # free reshape; no transpose needed


# ----------------------------------------------------------------------------
# Parameter construction (deterministic, synthetic; stored in f32)
# ----------------------------------------------------------------------------
def make_params(d_query, d_key, d_value, nhead, dim_feedforward, seed=42):
  key = jax.random.PRNGKey(seed)
  ks = jax.random.split(key, 20)
  i = 0

  def lin(din, dout):
    nonlocal i
    w = 0.05 * jax.random.normal(ks[i], (din, dout), jnp.float32)
    b = 0.01 * jax.random.normal(ks[i + 1], (1, dout), jnp.float32)
    i += 2
    return w, b

  qw1, qb1 = lin(d_query, HIDDEN_DIM)
  qw2, qb2 = lin(HIDDEN_DIM, nhead * d_query)
  kw1, kb1 = lin(d_key, HIDDEN_DIM)
  kw2, kb2 = lin(HIDDEN_DIM, nhead * d_key)
  vw1, vb1 = lin(d_value, HIDDEN_DIM)
  vw2, vb2 = lin(HIDDEN_DIM, nhead * d_value)
  ow, ob = lin(nhead * d_value, d_value)
  f1w, f1b = lin(d_value, dim_feedforward)
  f2w, f2b = lin(dim_feedforward, d_value)

  return dict(
      nhead=nhead, d_query=d_query, d_key=d_key, d_value=d_value,
      q_proj=(qw1, qb1, qw2, qb2),
      k_proj=(kw1, kb1, kw2, kb2),
      v_proj=(vw1, vb1, vw2, vb2),
      out=(ow, ob), ff1=(f1w, f1b), ff2=(f2w, f2b),
  )


# ----------------------------------------------------------------------------
# Pure-JAX references.  mxu_dtype=bf16 mirrors the kernel's MXU operand
# rounding; mxu_dtype=f32 is the exact module semantics.
# ----------------------------------------------------------------------------
def reference_forward(params, query, key, value, mxu_dtype=jnp.float32):
  T, B, dq = query.shape
  S = key.shape[0]
  nhead = params["nhead"]
  dk = params["d_key"]
  dv = params["d_value"]
  scaling = float(dq) ** (-0.5)

  def c(x):  # round operands the way the kernel's MXU path does
    return x.astype(mxu_dtype).astype(jnp.float32)

  def mlp(x, w1, b1, w2, b2):
    h = jnp.maximum(c(x) @ c(w1) + b1, 0.0)
    return c(h) @ c(w2) + b2

  qw1, qb1, qw2, qb2 = params["q_proj"]
  q = mlp(query.reshape(T * B, dq), qw1, qb1, qw2 * scaling, qb2 * scaling)
  k = mlp(key.reshape(S * B, dk), *params["k_proj"])
  v = mlp(value.reshape(S * B, dv), *params["v_proj"])

  q = q.reshape(T, B * nhead, dq).transpose(1, 0, 2)
  k = k.reshape(S, B * nhead, dk).transpose(1, 0, 2)
  v = v.reshape(S, B * nhead, dv).transpose(1, 0, 2)
  s = jnp.einsum("btd,bsd->bts", c(q), c(k))
  p = jax.nn.softmax(s, axis=-1)
  a = jnp.einsum("bts,bsd->btd", c(p), c(v))
  a = a.transpose(1, 0, 2).reshape(T * B, nhead * dv)

  ow, ob = params["out"]
  src = c(a) @ c(ow) + ob
  src = jnp.where(jnp.isnan(src), 0.0, src)
  f1w, f1b = params["ff1"]
  f2w, f2b = params["ff2"]
  out = jnp.maximum(c(src) @ c(f1w) + f1b, 0.0)
  out = c(out) @ c(f2w) + f2b
  return out.reshape(T, B, dv)


if __name__ == "__main__":
  # Small shapes consistent with the module's seq-first convention.
  tgt_len, src_len, bsz = 8, 8, 2
  d_query = d_key = d_value = 32
  nhead = 2
  dim_feedforward = 64

  params = make_params(d_query, d_key, d_value, nhead, dim_feedforward)

  rng = jax.random.PRNGKey(0)
  kq, kk, kv = jax.random.split(rng, 3)
  query = jax.random.normal(kq, (tgt_len, bsz, d_query), jnp.float32)
  key = jax.random.normal(kk, (src_len, bsz, d_key), jnp.float32)
  value = jax.random.normal(kv, (src_len, bsz, d_value), jnp.float32)

  out = attention_layer_forward(params, query, key, value)
  out = jax.block_until_ready(out)
  assert out.shape == (tgt_len, bsz, d_value)

  ref_bf16 = reference_forward(params, query, key, value, mxu_dtype=jnp.bfloat16)
  ref_f32 = reference_forward(params, query, key, value, mxu_dtype=jnp.float32)
  assert jnp.allclose(out, ref_bf16, atol=1e-2, rtol=1e-2), "mismatch vs bf16-matched ref"
  assert jnp.allclose(out, ref_f32, atol=3e-2, rtol=3e-2), "mismatch vs f32 ref"

  print("KERNEL_OK")
</pallas_src>

<mosaic_0001>
module attributes {stable_mosaic.version = 11 : i64} {
  func.func @_fused_layer_kernel(%arg0: i32, %arg1: memref<16x32xf32, #tpu.memory_space<vmem>>, %arg2: memref<16x32xf32, #tpu.memory_space<vmem>>, %arg3: memref<16x32xf32, #tpu.memory_space<vmem>>, %arg4: memref<32x256xbf16, #tpu.memory_space<vmem>>, %arg5: memref<1x256xf32, #tpu.memory_space<vmem>>, %arg6: memref<256x64xbf16, #tpu.memory_space<vmem>>, %arg7: memref<1x64xf32, #tpu.memory_space<vmem>>, %arg8: memref<32x256xbf16, #tpu.memory_space<vmem>>, %arg9: memref<1x256xf32, #tpu.memory_space<vmem>>, %arg10: memref<256x64xbf16, #tpu.memory_space<vmem>>, %arg11: memref<1x64xf32, #tpu.memory_space<vmem>>, %arg12: memref<32x256xbf16, #tpu.memory_space<vmem>>, %arg13: memref<1x256xf32, #tpu.memory_space<vmem>>, %arg14: memref<256x64xbf16, #tpu.memory_space<vmem>>, %arg15: memref<1x64xf32, #tpu.memory_space<vmem>>, %arg16: memref<64x32xbf16, #tpu.memory_space<vmem>>, %arg17: memref<1x32xf32, #tpu.memory_space<vmem>>, %arg18: memref<32x64xbf16, #tpu.memory_space<vmem>>, %arg19: memref<1x64xf32, #tpu.memory_space<vmem>>, %arg20: memref<64x32xbf16, #tpu.memory_space<vmem>>, %arg21: memref<1x32xf32, #tpu.memory_space<vmem>>, %arg22: memref<8x64xf32, #tpu.memory_space<vmem>>, %arg23: memref<16x64xf32, #tpu.memory_space<vmem>>, %arg24: memref<16x64xf32, #tpu.memory_space<vmem>>, %arg25: memref<16x64xf32, #tpu.memory_space<vmem>>) attributes {dimension_semantics = [#tpu.dimension_semantics<arbitrary>], iteration_bounds = array<i64: 1>, scalar_prefetch = 0 : i64, scratch_operands = 3 : i64, tpu.core_type = #tpu.core_type<tc>, window_params = [{pipeline_mode = #tpu.pipeline_mode<synchronous>, transform_indices = @transform_0, window_bounds = array<i64: 16, 32>}, {pipeline_mode = #tpu.pipeline_mode<synchronous>, transform_indices = @transform_1, window_bounds = array<i64: 16, 32>}, {pipeline_mode = #tpu.pipeline_mode<synchronous>, transform_indices = @transform_2, window_bounds = array<i64: 16, 32>}, {pipeline_mode = #tpu.pipeline_mode<synchronous>, transform_indices = @transform_3, window_bounds = array<i64: 32, 256>}, {pipeline_mode = #tpu.pipeline_mode<synchronous>, transform_indices = @transform_4, window_bounds = array<i64: 1, 256>}, {pipeline_mode = #tpu.pipeline_mode<synchronous>, transform_indices = @transform_5, window_bounds = array<i64: 256, 64>}, {pipeline_mode = #tpu.pipeline_mode<synchronous>, transform_indices = @transform_6, window_bounds = array<i64: 1, 64>}, {pipeline_mode = #tpu.pipeline_mode<synchronous>, transform_indices = @transform_7, window_bounds = array<i64: 32, 256>}, {pipeline_mode = #tpu.pipeline_mode<synchronous>, transform_indices = @transform_8, window_bounds = array<i64: 1, 256>}, {pipeline_mode = #tpu.pipeline_mode<synchronous>, transform_indices = @transform_9, window_bounds = array<i64: 256, 64>}, {pipeline_mode = #tpu.pipeline_mode<synchronous>, transform_indices = @transform_10, window_bounds = array<i64: 1, 64>}, {pipeline_mode = #tpu.pipeline_mode<synchronous>, transform_indices = @transform_11, window_bounds = array<i64: 32, 256>}, {pipeline_mode = #tpu.pipeline_mode<synchronous>, transform_indices = @transform_12, window_bounds = array<i64: 1, 256>}, {pipeline_mode = #tpu.pipeline_mode<synchronous>, transform_indices = @transform_13, window_bounds = array<i64: 256, 64>}, {pipeline_mode = #tpu.pipeline_mode<synchronous>, transform_indices = @transform_14, window_bounds = array<i64: 1, 64>}, {pipeline_mode = #tpu.pipeline_mode<synchronous>, transform_indices = @transform_15, window_bounds = array<i64: 64, 32>}, {pipeline_mode = #tpu.pipeline_mode<synchronous>, transform_indices = @transform_16, window_bounds = array<i64: 1, 32>}, {pipeline_mode = #tpu.pipeline_mode<synchronous>, transform_indices = @transform_17, window_bounds = array<i64: 32, 64>}, {pipeline_mode = #tpu.pipeline_mode<synchronous>, transform_indices = @transform_18, window_bounds = array<i64: 1, 64>}, {pipeline_mode = #tpu.pipeline_mode<synchronous>, transform_indices = @transform_19, window_bounds = array<i64: 64, 32>}, {pipeline_mode = #tpu.pipeline_mode<synchronous>, transform_indices = @transform_20, window_bounds = array<i64: 1, 32>}, {pipeline_mode = #tpu.pipeline_mode<synchronous>, transform_indices = @transform_21, window_bounds = array<i64: 8, 64>}]} {
    %c0 = arith.constant 0 : index
    %c0_0 = arith.constant 0 : index
    %0 = vector.load %arg1[%c0, %c0_0] : memref<16x32xf32, #tpu.memory_space<vmem>>, vector<16x32xf32>
    %1 = arith.truncf %0 : vector<16x32xf32> to vector<16x32xbf16>
    %c0_1 = arith.constant 0 : index
    %c0_2 = arith.constant 0 : index
    %2 = vector.load %arg4[%c0_1, %c0_2] : memref<32x256xbf16, #tpu.memory_space<vmem>>, vector<32x256xbf16>
    %cst = arith.constant dense<0.000000e+00> : vector<16x256xf32>
    %3 = tpu.matmul %1, %2, %cst {dimension_numbers = #tpu.dot_dimension_numbers<[1], [0], [0], [1], [0, 0, 1, 1], [], []>} : vector<16x32xbf16>, vector<32x256xbf16>, vector<16x256xf32> -> vector<16x256xf32>
    %c0_3 = arith.constant 0 : index
    %c0_4 = arith.constant 0 : index
    %4 = vector.load %arg5[%c0_3, %c0_4] : memref<1x256xf32, #tpu.memory_space<vmem>>, vector<1x256xf32>
    %5 = vector.broadcast %4 : vector<1x256xf32> to vector<16x256xf32>
    %6 = arith.addf %3, %5 : vector<16x256xf32>
    %cst_5 = arith.constant 0.000000e+00 : f32
    %7 = vector.broadcast %cst_5 : f32 to vector<16x256xf32>
    %8 = arith.maximumf %6, %7 : vector<16x256xf32>
    %9 = arith.truncf %8 : vector<16x256xf32> to vector<16x256xbf16>
    %c0_6 = arith.constant 0 : index
    %c0_7 = arith.constant 0 : index
    %10 = vector.load %arg6[%c0_6, %c0_7] : memref<256x64xbf16, #tpu.memory_space<vmem>>, vector<256x64xbf16>
    %cst_8 = arith.constant dense<0.000000e+00> : vector<16x64xf32>
    %11 = tpu.matmul %9, %10, %cst_8 {dimension_numbers = #tpu.dot_dimension_numbers<[1], [0], [0], [1], [0, 0, 1, 1], [], []>} : vector<16x256xbf16>, vector<256x64xbf16>, vector<16x64xf32> -> vector<16x64xf32>
    %c0_9 = arith.constant 0 : index
    %c0_10 = arith.constant 0 : index
    %12 = vector.load %arg7[%c0_9, %c0_10] : memref<1x64xf32, #tpu.memory_space<vmem>>, vector<1x64xf32>
    %13 = vector.broadcast %12 : vector<1x64xf32> to vector<16x64xf32>
    %14 = arith.addf %11, %13 : vector<16x64xf32>
    %c0_11 = arith.constant 0 : index
    %c0_12 = arith.constant 0 : index
    %15 = vector.load %arg23[%c0_11, %c0_12] : memref<16x64xf32, #tpu.memory_space<vmem>>, vector<16x64xf32>
    tpu.vector_store %arg23[%c0_11, %c0_12], %14 {strides = array<i32>} : memref<16x64xf32, #tpu.memory_space<vmem>>, vector<16x64xf32>,
    %c0_13 = arith.constant 0 : index
    %c0_14 = arith.constant 0 : index
    %16 = vector.load %arg2[%c0_13, %c0_14] : memref<16x32xf32, #tpu.memory_space<vmem>>, vector<16x32xf32>
    %17 = arith.truncf %16 : vector<16x32xf32> to vector<16x32xbf16>
    %c0_15 = arith.constant 0 : index
    %c0_16 = arith.constant 0 : index
    %18 = vector.load %arg8[%c0_15, %c0_16] : memref<32x256xbf16, #tpu.memory_space<vmem>>, vector<32x256xbf16>
    %cst_17 = arith.constant dense<0.000000e+00> : vector<16x256xf32>
    %19 = tpu.matmul %17, %18, %cst_17 {dimension_numbers = #tpu.dot_dimension_numbers<[1], [0], [0], [1], [0, 0, 1, 1], [], []>} : vector<16x32xbf16>, vector<32x256xbf16>, vector<16x256xf32> -> vector<16x256xf32>
    %c0_18 = arith.constant 0 : index
    %c0_19 = arith.constant 0 : index
    %20 = vector.load %arg9[%c0_18, %c0_19] : memref<1x256xf32, #tpu.memory_space<vmem>>, vector<1x256xf32>
    %21 = vector.broadcast %20 : vector<1x256xf32> to vector<16x256xf32>
    %22 = arith.addf %19, %21 : vector<16x256xf32>
    %cst_20 = arith.constant 0.000000e+00 : f32
    %23 = vector.broadcast %cst_20 : f32 to vector<16x256xf32>
    %24 = arith.maximumf %22, %23 : vector<16x256xf32>
    %25 = arith.truncf %24 : vector<16x256xf32> to vector<16x256xbf16>
    %c0_21 = arith.constant 0 : index
    %c0_22 = arith.constant 0 : index
    %26 = vector.load %arg10[%c0_21, %c0_22] : memref<256x64xbf16, #tpu.memory_space<vmem>>, vector<256x64xbf16>
    %cst_23 = arith.constant dense<0.000000e+00> : vector<16x64xf32>
    %27 = tpu.matmul %25, %26, %cst_23 {dimension_numbers = #tpu.dot_dimension_numbers<[1], [0], [0], [1], [0, 0, 1, 1], [], []>} : vector<16x256xbf16>, vector<256x64xbf16>, vector<16x64xf32> -> vector<16x64xf32>
    %c0_24 = arith.constant 0 : index
    %c0_25 = arith.constant 0 : index
    %28 = vector.load %arg11[%c0_24, %c0_25] : memref<1x64xf32, #tpu.memory_space<vmem>>, vector<1x64xf32>
    %29 = vector.broadcast %28 : vector<1x64xf32> to vector<16x64xf32>
    %30 = arith.addf %27, %29 : vector<16x64xf32>
    %c0_26 = arith.constant 0 : index
    %c0_27 = arith.constant 0 : index
    %31 = vector.load %arg24[%c0_26, %c0_27] : memref<16x64xf32, #tpu.memory_space<vmem>>, vector<16x64xf32>
    tpu.vector_store %arg24[%c0_26, %c0_27], %30 {strides = array<i32>} : memref<16x64xf32, #tpu.memory_space<vmem>>, vector<16x64xf32>,
    %c0_28 = arith.constant 0 : index
    %c0_29 = arith.constant 0 : index
    %32 = vector.load %arg3[%c0_28, %c0_29] : memref<16x32xf32, #tpu.memory_space<vmem>>, vector<16x32xf32>
    %33 = arith.truncf %32 : vector<16x32xf32> to vector<16x32xbf16>
    %c0_30 = arith.constant 0 : index
    %c0_31 = arith.constant 0 : index
    %34 = vector.load %arg12[%c0_30, %c0_31] : memref<32x256xbf16, #tpu.memory_space<vmem>>, vector<32x256xbf16>
    %cst_32 = arith.constant dense<0.000000e+00> : vector<16x256xf32>
    %35 = tpu.matmul %33, %34, %cst_32 {dimension_numbers = #tpu.dot_dimension_numbers<[1], [0], [0], [1], [0, 0, 1, 1], [], []>} : vector<16x32xbf16>, vector<32x256xbf16>, vector<16x256xf32> -> vector<16x256xf32>
    %c0_33 = arith.constant 0 : index
    %c0_34 = arith.constant 0 : index
    %36 = vector.load %arg13[%c0_33, %c0_34] : memref<1x256xf32, #tpu.memory_space<vmem>>, vector<1x256xf32>
    %37 = vector.broadcast %36 : vector<1x256xf32> to vector<16x256xf32>
    %38 = arith.addf %35, %37 : vector<16x256xf32>
    %cst_35 = arith.constant 0.000000e+00 : f32
    %39 = vector.broadcast %cst_35 : f32 to vector<16x256xf32>
    %40 = arith.maximumf %38, %39 : vector<16x256xf32>
    %41 = arith.truncf %40 : vector<16x256xf32> to vector<16x256xbf16>
    %c0_36 = arith.constant 0 : index
    %c0_37 = arith.constant 0 : index
    %42 = vector.load %arg14[%c0_36, %c0_37] : memref<256x64xbf16, #tpu.memory_space<vmem>>, vector<256x64xbf16>
    %cst_38 = arith.constant dense<0.000000e+00> : vector<16x64xf32>
    %43 = tpu.matmul %41, %42, %cst_38 {dimension_numbers = #tpu.dot_dimension_numbers<[1], [0], [0], [1], [0, 0, 1, 1], [], []>} : vector<16x256xbf16>, vector<256x64xbf16>, vector<16x64xf32> -> vector<16x64xf32>
    %c0_39 = arith.constant 0 : index
    %c0_40 = arith.constant 0 : index
    %44 = vector.load %arg15[%c0_39, %c0_40] : memref<1x64xf32, #tpu.memory_space<vmem>>, vector<1x64xf32>
    %45 = vector.broadcast %44 : vector<1x64xf32> to vector<16x64xf32>
    %46 = arith.addf %43, %45 : vector<16x64xf32>
    %c0_41 = arith.constant 0 : index
    %c0_42 = arith.constant 0 : index
    %47 = vector.load %arg25[%c0_41, %c0_42] : memref<16x64xf32, #tpu.memory_space<vmem>>, vector<16x64xf32>
    tpu.vector_store %arg25[%c0_41, %c0_42], %46 {strides = array<i32>} : memref<16x64xf32, #tpu.memory_space<vmem>>, vector<16x64xf32>,
    %c0_43 = arith.constant 0 : index
    %c0_44 = arith.constant 0 : index
    %48 = tpu.strided_load %arg23[%c0_43, %c0_44] {strides = array<i32: 2, 1>} : memref<16x64xf32, #tpu.memory_space<vmem>>, vector<8x64xf32>
    %49 = arith.truncf %48 : vector<8x64xf32> to vector<8x64xbf16>
    %c0_45 = arith.constant 0 : index
    %c0_46 = arith.constant 0 : index
    %50 = tpu.strided_load %arg24[%c0_45, %c0_46] {strides = array<i32: 2, 1>} : memref<16x64xf32, #tpu.memory_space<vmem>>, vector<8x64xf32>
    %51 = arith.truncf %50 : vector<8x64xf32> to vector<8x64xbf16>
    %c0_47 = arith.constant 0 : index
    %c0_48 = arith.constant 0 : index
    %52 = tpu.strided_load %arg25[%c0_47, %c0_48] {strides = array<i32: 2, 1>} : memref<16x64xf32, #tpu.memory_space<vmem>>, vector<8x64xf32>
    %53 = arith.truncf %52 : vector<8x64xf32> to vector<8x64xbf16>
    %54 = vector.extract_strided_slice %49 {offsets = [0, 0], sizes = [8, 32], strides = [1, 1]} : vector<8x64xbf16> to vector<8x32xbf16>
    %55 = vector.extract_strided_slice %51 {offsets = [0, 0], sizes = [8, 32], strides = [1, 1]} : vector<8x64xbf16> to vector<8x32xbf16>
    %56 = vector.extract_strided_slice %53 {offsets = [0, 0], sizes = [8, 32], strides = [1, 1]} : vector<8x64xbf16> to vector<8x32xbf16>
    %cst_49 = arith.constant dense<0.000000e+00> : vector<8x8xf32>
    %57 = tpu.matmul %54, %55, %cst_49 {dimension_numbers = #tpu.dot_dimension_numbers<[1], [1], [0], [0], [0, 0, 1, 0], [], []>} : vector<8x32xbf16>, vector<8x32xbf16>, vector<8x8xf32> -> vector<8x8xf32>
    %cst_50 = arith.constant dense<0xFF800000> : vector<8xf32>
    %58 = vector.multi_reduction <maximumf>, %57, %cst_50 [1] : vector<8x8xf32> to vector<8xf32>
    %59 = vector.shape_cast %58 : vector<8xf32> to vector<8x1xf32>
    %60 = vector.broadcast %59 : vector<8x1xf32> to vector<8x8xf32>
    %61 = arith.subf %57, %60 : vector<8x8xf32>
    %62 = math.exp %61 : vector<8x8xf32>
    %63 = arith.truncf %62 : vector<8x8xf32> to vector<8x8xbf16>
    %cst_51 = arith.constant dense<0.000000e+00> : vector<8x32xf32>
    %64 = tpu.matmul %63, %56, %cst_51 {dimension_numbers = #tpu.dot_dimension_numbers<[1], [0], [0], [1], [0, 0, 1, 1], [], []>} : vector<8x8xbf16>, vector<8x32xbf16>, vector<8x32xf32> -> vector<8x32xf32>
    %cst_52 = arith.constant dense<0.000000e+00> : vector<8xf32>
    %65 = vector.multi_reduction <add>, %62, %cst_52 [1] : vector<8x8xf32> to vector<8xf32>
    %66 = vector.shape_cast %65 : vector<8xf32> to vector<8x1xf32>
    %67 = tpu.reciprocal %66 {approx = true} : vector<8x1xf32> -> vector<8x1xf32>
    %68 = vector.broadcast %67 : vector<8x1xf32> to vector<8x32xf32>
    %69 = arith.mulf %64, %68 : vector<8x32xf32>
    %70 = arith.truncf %69 : vector<8x32xf32> to vector<8x32xbf16>
    %71 = vector.extract_strided_slice %49 {offsets = [0, 32], sizes = [8, 32], strides = [1, 1]} : vector<8x64xbf16> to vector<8x32xbf16>
    %72 = vector.extract_strided_slice %51 {offsets = [0, 32], sizes = [8, 32], strides = [1, 1]} : vector<8x64xbf16> to vector<8x32xbf16>
    %73 = vector.extract_strided_slice %53 {offsets = [0, 32], sizes = [8, 32], strides = [1, 1]} : vector<8x64xbf16> to vector<8x32xbf16>
    %cst_53 = arith.constant dense<0.000000e+00> : vector<8x8xf32>
    %74 = tpu.matmul %71, %72, %cst_53 {dimension_numbers = #tpu.dot_dimension_numbers<[1], [1], [0], [0], [0, 0, 1, 0], [], []>} : vector<8x32xbf16>, vector<8x32xbf16>, vector<8x8xf32> -> vector<8x8xf32>
    %cst_54 = arith.constant dense<0xFF800000> : vector<8xf32>
    %75 = vector.multi_reduction <maximumf>, %74, %cst_54 [1] : vector<8x8xf32> to vector<8xf32>
    %76 = vector.shape_cast %75 : vector<8xf32> to vector<8x1xf32>
    %77 = vector.broadcast %76 : vector<8x1xf32> to vector<8x8xf32>
    %78 = arith.subf %74, %77 : vector<8x8xf32>
    %79 = math.exp %78 : vector<8x8xf32>
    %80 = arith.truncf %79 : vector<8x8xf32> to vector<8x8xbf16>
    %cst_55 = arith.constant dense<0.000000e+00> : vector<8x32xf32>
    %81 = tpu.matmul %80, %73, %cst_55 {dimension_numbers = #tpu.dot_dimension_numbers<[1], [0], [0], [1], [0, 0, 1, 1], [], []>} : vector<8x8xbf16>, vector<8x32xbf16>, vector<8x32xf32> -> vector<8x32xf32>
    %cst_56 = arith.constant dense<0.000000e+00> : vector<8xf32>
    %82 = vector.multi_reduction <add>, %79, %cst_56 [1] : vector<8x8xf32> to vector<8xf32>
    %83 = vector.shape_cast %82 : vector<8xf32> to vector<8x1xf32>
    %84 = tpu.reciprocal %83 {approx = true} : vector<8x1xf32> -> vector<8x1xf32>
    %85 = vector.broadcast %84 : vector<8x1xf32> to vector<8x32xf32>
    %86 = arith.mulf %81, %85 : vector<8x32xf32>
    %87 = arith.truncf %86 : vector<8x32xf32> to vector<8x32xbf16>
    %88 = tpu.concatenate %70, %87 in 1 : vector<8x32xbf16>, vector<8x32xbf16> -> vector<8x64xbf16>
    %c0_57 = arith.constant 0 : index
    %c0_58 = arith.constant 0 : index
    %89 = vector.load %arg16[%c0_57, %c0_58] : memref<64x32xbf16, #tpu.memory_space<vmem>>, vector<64x32xbf16>
    %cst_59 = arith.constant dense<0.000000e+00> : vector<8x32xf32>
    %90 = tpu.matmul %88, %89, %cst_59 {dimension_numbers = #tpu.dot_dimension_numbers<[1], [0], [0], [1], [0, 0, 1, 1], [], []>} : vector<8x64xbf16>, vector<64x32xbf16>, vector<8x32xf32> -> vector<8x32xf32>
    %c0_60 = arith.constant 0 : index
    %c0_61 = arith.constant 0 : index
    %91 = vector.load %arg17[%c0_60, %c0_61] : memref<1x32xf32, #tpu.memory_space<vmem>>, vector<1x32xf32>
    %92 = vector.broadcast %91 : vector<1x32xf32> to vector<8x32xf32>
    %93 = arith.addf %90, %92 : vector<8x32xf32>
    %94 = arith.cmpf one, %93, %93 : vector<8x32xf32>
    %cst_62 = arith.constant 0.000000e+00 : f32
    %95 = vector.broadcast %cst_62 : f32 to vector<8x32xf32>
    %96 = arith.select %94, %95, %93 : vector<8x32xi1>, vector<8x32xf32>
    %97 = arith.truncf %96 : vector<8x32xf32> to vector<8x32xbf16>
    %c0_63 = arith.constant 0 : index
    %c0_64 = arith.constant 0 : index
    %98 = vector.load %arg18[%c0_63, %c0_64] : memref<32x64xbf16, #tpu.memory_space<vmem>>, vector<32x64xbf16>
    %cst_65 = arith.constant dense<0.000000e+00> : vector<8x64xf32>
    %99 = tpu.matmul %97, %98, %cst_65 {dimension_numbers = #tpu.dot_dimension_numbers<[1], [0], [0], [1], [0, 0, 1, 1], [], []>} : vector<8x32xbf16>, vector<32x64xbf16>, vector<8x64xf32> -> vector<8x64xf32>
    %c0_66 = arith.constant 0 : index
    %c0_67 = arith.constant 0 : index
    %100 = vector.load %arg19[%c0_66, %c0_67] : memref<1x64xf32, #tpu.memory_space<vmem>>, vector<1x64xf32>
    %101 = vector.broadcast %100 : vector<1x64xf32> to vector<8x64xf32>
    %102 = arith.addf %99, %101 : vector<8x64xf32>
    %cst_68 = arith.constant 0.000000e+00 : f32
    %103 = vector.broadcast %cst_68 : f32 to vector<8x64xf32>
    %104 = arith.maximumf %102, %103 : vector<8x64xf32>
    %105 = arith.truncf %104 : vector<8x64xf32> to vector<8x64xbf16>
    %c0_69 = arith.constant 0 : index
    %c0_70 = arith.constant 0 : index
    %106 = vector.load %arg20[%c0_69, %c0_70] : memref<64x32xbf16, #tpu.memory_space<vmem>>, vector<64x32xbf16>
    %cst_71 = arith.constant dense<0.000000e+00> : vector<8x32xf32>
    %107 = tpu.matmul %105, %106, %cst_71 {dimension_numbers = #tpu.dot_dimension_numbers<[1], [0], [0], [1], [0, 0, 1, 1], [], []>} : vector<8x64xbf16>, vector<64x32xbf16>, vector<8x32xf32> -> vector<8x32xf32>
    %c0_72 = arith.constant 0 : index
    %c0_73 = arith.constant 0 : index
    %108 = vector.load %arg21[%c0_72, %c0_73] : memref<1x32xf32, #tpu.memory_space<vmem>>, vector<1x32xf32>
    %109 = vector.broadcast %108 : vector<1x32xf32> to vector<8x32xf32>
    %110 = arith.addf %107, %109 : vector<8x32xf32>
    %c0_74 = arith.constant 0 : index
    %c0_75 = arith.constant 0 : index
    %111 = vector.load %arg22[%c0_74, %c0_75] : memref<8x64xf32, #tpu.memory_space<vmem>>, vector<8x32xf32>
    tpu.vector_store %arg22[%c0_74, %c0_75], %110 {strides = array<i32>} : memref<8x64xf32, #tpu.memory_space<vmem>>, vector<8x32xf32>,
    %c1 = arith.constant 1 : index
    %c0_76 = arith.constant 0 : index
    %112 = tpu.strided_load %arg23[%c1, %c0_76] {strides = array<i32: 2, 1>} : memref<16x64xf32, #tpu.memory_space<vmem>>, vector<8x64xf32>
    %113 = arith.truncf %112 : vector<8x64xf32> to vector<8x64xbf16>
    %c1_77 = arith.constant 1 : index
    %c0_78 = arith.constant 0 : index
    %114 = tpu.strided_load %arg24[%c1_77, %c0_78] {strides = array<i32: 2, 1>} : memref<16x64xf32, #tpu.memory_space<vmem>>, vector<8x64xf32>
    %115 = arith.truncf %114 : vector<8x64xf32> to vector<8x64xbf16>
    %c1_79 = arith.constant 1 : index
    %c0_80 = arith.constant 0 : index
    %116 = tpu.strided_load %arg25[%c1_79, %c0_80] {strides = array<i32: 2, 1>} : memref<16x64xf32, #tpu.memory_space<vmem>>, vector<8x64xf32>
    %117 = arith.truncf %116 : vector<8x64xf32> to vector<8x64xbf16>
    %118 = vector.extract_strided_slice %113 {offsets = [0, 0], sizes = [8, 32], strides = [1, 1]} : vector<8x64xbf16> to vector<8x32xbf16>
    %119 = vector.extract_strided_slice %115 {offsets = [0, 0], sizes = [8, 32], strides = [1, 1]} : vector<8x64xbf16> to vector<8x32xbf16>
    %120 = vector.extract_strided_slice %117 {offsets = [0, 0], sizes = [8, 32], strides = [1, 1]} : vector<8x64xbf16> to vector<8x32xbf16>
    %cst_81 = arith.constant dense<0.000000e+00> : vector<8x8xf32>
    %121 = tpu.matmul %118, %119, %cst_81 {dimension_numbers = #tpu.dot_dimension_numbers<[1], [1], [0], [0], [0, 0, 1, 0], [], []>} : vector<8x32xbf16>, vector<8x32xbf16>, vector<8x8xf32> -> vector<8x8xf32>
    %cst_82 = arith.constant dense<0xFF800000> : vector<8xf32>
    %122 = vector.multi_reduction <maximumf>, %121, %cst_82 [1] : vector<8x8xf32> to vector<8xf32>
    %123 = vector.shape_cast %122 : vector<8xf32> to vector<8x1xf32>
    %124 = vector.broadcast %123 : vector<8x1xf32> to vector<8x8xf32>
    %125 = arith.subf %121, %124 : vector<8x8xf32>
    %126 = math.exp %125 : vector<8x8xf32>
    %127 = arith.truncf %126 : vector<8x8xf32> to vector<8x8xbf16>
    %cst_83 = arith.constant dense<0.000000e+00> : vector<8x32xf32>
    %128 = tpu.matmul %127, %120, %cst_83 {dimension_numbers = #tpu.dot_dimension_numbers<[1], [0], [0], [1], [0, 0, 1, 1], [], []>} : vector<8x8xbf16>, vector<8x32xbf16>, vector<8x32xf32> -> vector<8x32xf32>
    %cst_84 = arith.constant dense<0.000000e+00> : vector<8xf32>
    %129 = vector.multi_reduction <add>, %126, %cst_84 [1] : vector<8x8xf32> to vector<8xf32>
    %130 = vector.shape_cast %129 : vector<8xf32> to vector<8x1xf32>
    %131 = tpu.reciprocal %130 {approx = true} : vector<8x1xf32> -> vector<8x1xf32>
    %132 = vector.broadcast %131 : vector<8x1xf32> to vector<8x32xf32>
    %133 = arith.mulf %128, %132 : vector<8x32xf32>
    %134 = arith.truncf %133 : vector<8x32xf32> to vector<8x32xbf16>
    %135 = vector.extract_strided_slice %113 {offsets = [0, 32], sizes = [8, 32], strides = [1, 1]} : vector<8x64xbf16> to vector<8x32xbf16>
    %136 = vector.extract_strided_slice %115 {offsets = [0, 32], sizes = [8, 32], strides = [1, 1]} : vector<8x64xbf16> to vector<8x32xbf16>
    %137 = vector.extract_strided_slice %117 {offsets = [0, 32], sizes = [8, 32], strides = [1, 1]} : vector<8x64xbf16> to vector<8x32xbf16>
    %cst_85 = arith.constant dense<0.000000e+00> : vector<8x8xf32>
    %138 = tpu.matmul %135, %136, %cst_85 {dimension_numbers = #tpu.dot_dimension_numbers<[1], [1], [0], [0], [0, 0, 1, 0], [], []>} : vector<8x32xbf16>, vector<8x32xbf16>, vector<8x8xf32> -> vector<8x8xf32>
    %cst_86 = arith.constant dense<0xFF800000> : vector<8xf32>
    %139 = vector.multi_reduction <maximumf>, %138, %cst_86 [1] : vector<8x8xf32> to vector<8xf32>
    %140 = vector.shape_cast %139 : vector<8xf32> to vector<8x1xf32>
    %141 = vector.broadcast %140 : vector<8x1xf32> to vector<8x8xf32>
    %142 = arith.subf %138, %141 : vector<8x8xf32>
    %143 = math.exp %142 : vector<8x8xf32>
    %144 = arith.truncf %143 : vector<8x8xf32> to vector<8x8xbf16>
    %cst_87 = arith.constant dense<0.000000e+00> : vector<8x32xf32>
    %145 = tpu.matmul %144, %137, %cst_87 {dimension_numbers = #tpu.dot_dimension_numbers<[1], [0], [0], [1], [0, 0, 1, 1], [], []>} : vector<8x8xbf16>, vector<8x32xbf16>, vector<8x32xf32> -> vector<8x32xf32>
    %cst_88 = arith.constant dense<0.000000e+00> : vector<8xf32>
    %146 = vector.multi_reduction <add>, %143, %cst_88 [1] : vector<8x8xf32> to vector<8xf32>
    %147 = vector.shape_cast %146 : vector<8xf32> to vector<8x1xf32>
    %148 = tpu.reciprocal %147 {approx = true} : vector<8x1xf32> -> vector<8x1xf32>
    %149 = vector.broadcast %148 : vector<8x1xf32> to vector<8x32xf32>
    %150 = arith.mulf %145, %149 : vector<8x32xf32>
    %151 = arith.truncf %150 : vector<8x32xf32> to vector<8x32xbf16>
    %152 = tpu.concatenate %134, %151 in 1 : vector<8x32xbf16>, vector<8x32xbf16> -> vector<8x64xbf16>
    %c0_89 = arith.constant 0 : index
    %c0_90 = arith.constant 0 : index
    %153 = vector.load %arg16[%c0_89, %c0_90] : memref<64x32xbf16, #tpu.memory_space<vmem>>, vector<64x32xbf16>
    %cst_91 = arith.constant dense<0.000000e+00> : vector<8x32xf32>
    %154 = tpu.matmul %152, %153, %cst_91 {dimension_numbers = #tpu.dot_dimension_numbers<[1], [0], [0], [1], [0, 0, 1, 1], [], []>} : vector<8x64xbf16>, vector<64x32xbf16>, vector<8x32xf32> -> vector<8x32xf32>
    %c0_92 = arith.constant 0 : index
    %c0_93 = arith.constant 0 : index
    %155 = vector.load %arg17[%c0_92, %c0_93] : memref<1x32xf32, #tpu.memory_space<vmem>>, vector<1x32xf32>
    %156 = vector.broadcast %155 : vector<1x32xf32> to vector<8x32xf32>
    %157 = arith.addf %154, %156 : vector<8x32xf32>
    %158 = arith.cmpf one, %157, %157 : vector<8x32xf32>
    %cst_94 = arith.constant 0.000000e+00 : f32
    %159 = vector.broadcast %cst_94 : f32 to vector<8x32xf32>
    %160 = arith.select %158, %159, %157 : vector<8x32xi1>, vector<8x32xf32>
    %161 = arith.truncf %160 : vector<8x32xf32> to vector<8x32xbf16>
    %c0_95 = arith.constant 0 : index
    %c0_96 = arith.constant 0 : index
    %162 = vector.load %arg18[%c0_95, %c0_96] : memref<32x64xbf16, #tpu.memory_space<vmem>>, vector<32x64xbf16>
    %cst_97 = arith.constant dense<0.000000e+00> : vector<8x64xf32>
    %163 = tpu.matmul %161, %162, %cst_97 {dimension_numbers = #tpu.dot_dimension_numbers<[1], [0], [0], [1], [0, 0, 1, 1], [], []>} : vector<8x32xbf16>, vector<32x64xbf16>, vector<8x64xf32> -> vector<8x64xf32>
    %c0_98 = arith.constant 0 : index
    %c0_99 = arith.constant 0 : index
    %164 = vector.load %arg19[%c0_98, %c0_99] : memref<1x64xf32, #tpu.memory_space<vmem>>, vector<1x64xf32>
    %165 = vector.broadcast %164 : vector<1x64xf32> to vector<8x64xf32>
    %166 = arith.addf %163, %165 : vector<8x64xf32>
    %cst_100 = arith.constant 0.000000e+00 : f32
    %167 = vector.broadcast %cst_100 : f32 to vector<8x64xf32>
    %168 = arith.maximumf %166, %167 : vector<8x64xf32>
    %169 = arith.truncf %168 : vector<8x64xf32> to vector<8x64xbf16>
    %c0_101 = arith.constant 0 : index
    %c0_102 = arith.constant 0 : index
    %170 = vector.load %arg20[%c0_101, %c0_102] : memref<64x32xbf16, #tpu.memory_space<vmem>>, vector<64x32xbf16>
    %cst_103 = arith.constant dense<0.000000e+00> : vector<8x32xf32>
    %171 = tpu.matmul %169, %170, %cst_103 {dimension_numbers = #tpu.dot_dimension_numbers<[1], [0], [0], [1], [0, 0, 1, 1], [], []>} : vector<8x64xbf16>, vector<64x32xbf16>, vector<8x32xf32> -> vector<8x32xf32>
    %c0_104 = arith.constant 0 : index
    %c0_105 = arith.constant 0 : index
    %172 = vector.load %arg21[%c0_104, %c0_105] : memref<1x32xf32, #tpu.memory_space<vmem>>, vector<1x32xf32>
    %173 = vector.broadcast %172 : vector<1x32xf32> to vector<8x32xf32>
    %174 = arith.addf %171, %173 : vector<8x32xf32>
    %c0_106 = arith.constant 0 : index
    %c32 = arith.constant 32 : index
    %175 = vector.load %arg22[%c0_106, %c32] : memref<8x64xf32, #tpu.memory_space<vmem>>, vector<8x32xf32>
    tpu.vector_store %arg22[%c0_106, %c32], %174 {strides = array<i32>} : memref<8x64xf32, #tpu.memory_space<vmem>>, vector<8x32xf32>,
    return
  }
  func.func @transform_0(%arg0: i32) -> (i32, i32) {
    %c0_i32 = arith.constant 0 : i32
    %c0_i32_0 = arith.constant 0 : i32
    %c0_i32_1 = arith.constant 0 : i32
    return %c0_i32, %c0_i32_0 : i32, i32
  }
  func.func @transform_1(%arg0: i32) -> (i32, i32) {
    %c0_i32 = arith.constant 0 : i32
    %c0_i32_0 = arith.constant 0 : i32
    %c0_i32_1 = arith.constant 0 : i32
    return %c0_i32, %c0_i32_0 : i32, i32
  }
  func.func @transform_2(%arg0: i32) -> (i32, i32) {
    %c0_i32 = arith.constant 0 : i32
    %c0_i32_0 = arith.constant 0 : i32
    %c0_i32_1 = arith.constant 0 : i32
    return %c0_i32, %c0_i32_0 : i32, i32
  }
  func.func @transform_3(%arg0: i32) -> (i32, i32) {
    %c0_i32 = arith.constant 0 : i32
    %c0_i32_0 = arith.constant 0 : i32
    %c0_i32_1 = arith.constant 0 : i32
    return %c0_i32, %c0_i32_0 : i32, i32
  }
  func.func @transform_4(%arg0: i32) -> (i32, i32) {
    %c0_i32 = arith.constant 0 : i32
    %c0_i32_0 = arith.constant 0 : i32
    %c0_i32_1 = arith.constant 0 : i32
    return %c0_i32, %c0_i32_0 : i32, i32
  }
  func.func @transform_5(%arg0: i32) -> (i32, i32) {
    %c0_i32 = arith.constant 0 : i32
    %c0_i32_0 = arith.constant 0 : i32
    %c0_i32_1 = arith.constant 0 : i32
    return %c0_i32, %c0_i32_0 : i32, i32
  }
  func.func @transform_6(%arg0: i32) -> (i32, i32) {
    %c0_i32 = arith.constant 0 : i32
    %c0_i32_0 = arith.constant 0 : i32
    %c0_i32_1 = arith.constant 0 : i32
    return %c0_i32, %c0_i32_0 : i32, i32
  }
  func.func @transform_7(%arg0: i32) -> (i32, i32) {
    %c0_i32 = arith.constant 0 : i32
    %c0_i32_0 = arith.constant 0 : i32
    %c0_i32_1 = arith.constant 0 : i32
    return %c0_i32, %c0_i32_0 : i32, i32
  }
  func.func @transform_8(%arg0: i32) -> (i32, i32) {
    %c0_i32 = arith.constant 0 : i32
    %c0_i32_0 = arith.constant 0 : i32
    %c0_i32_1 = arith.constant 0 : i32
    return %c0_i32, %c0_i32_0 : i32, i32
  }
  func.func @transform_9(%arg0: i32) -> (i32, i32) {
    %c0_i32 = arith.constant 0 : i32
    %c0_i32_0 = arith.constant 0 : i32
    %c0_i32_1 = arith.constant 0 : i32
    return %c0_i32, %c0_i32_0 : i32, i32
  }
  func.func @transform_10(%arg0: i32) -> (i32, i32) {
    %c0_i32 = arith.constant 0 : i32
    %c0_i32_0 = arith.constant 0 : i32
    %c0_i32_1 = arith.constant 0 : i32
    return %c0_i32, %c0_i32_0 : i32, i32
  }
  func.func @transform_11(%arg0: i32) -> (i32, i32) {
    %c0_i32 = arith.constant 0 : i32
    %c0_i32_0 = arith.constant 0 : i32
    %c0_i32_1 = arith.constant 0 : i32
    return %c0_i32, %c0_i32_0 : i32, i32
  }
  func.func @transform_12(%arg0: i32) -> (i32, i32) {
    %c0_i32 = arith.constant 0 : i32
    %c0_i32_0 = arith.constant 0 : i32
    %c0_i32_1 = arith.constant 0 : i32
    return %c0_i32, %c0_i32_0 : i32, i32
  }
  func.func @transform_13(%arg0: i32) -> (i32, i32) {
    %c0_i32 = arith.constant 0 : i32
    %c0_i32_0 = arith.constant 0 : i32
    %c0_i32_1 = arith.constant 0 : i32
    return %c0_i32, %c0_i32_0 : i32, i32
  }
  func.func @transform_14(%arg0: i32) -> (i32, i32) {
    %c0_i32 = arith.constant 0 : i32
    %c0_i32_0 = arith.constant 0 : i32
    %c0_i32_1 = arith.constant 0 : i32
    return %c0_i32, %c0_i32_0 : i32, i32
  }
  func.func @transform_15(%arg0: i32) -> (i32, i32) {
    %c0_i32 = arith.constant 0 : i32
    %c0_i32_0 = arith.constant 0 : i32
    %c0_i32_1 = arith.constant 0 : i32
    return %c0_i32, %c0_i32_0 : i32, i32
  }
  func.func @transform_16(%arg0: i32) -> (i32, i32) {
    %c0_i32 = arith.constant 0 : i32
    %c0_i32_0 = arith.constant 0 : i32
    %c0_i32_1 = arith.constant 0 : i32
    return %c0_i32, %c0_i32_0 : i32, i32
  }
  func.func @transform_17(%arg0: i32) -> (i32, i32) {
    %c0_i32 = arith.constant 0 : i32
    %c0_i32_0 = arith.constant 0 : i32
    %c0_i32_1 = arith.constant 0 : i32
    return %c0_i32, %c0_i32_0 : i32, i32
  }
  func.func @transform_18(%arg0: i32) -> (i32, i32) {
    %c0_i32 = arith.constant 0 : i32
    %c0_i32_0 = arith.constant 0 : i32
    %c0_i32_1 = arith.constant 0 : i32
    return %c0_i32, %c0_i32_0 : i32, i32
  }
  func.func @transform_19(%arg0: i32) -> (i32, i32) {
    %c0_i32 = arith.constant 0 : i32
    %c0_i32_0 = arith.constant 0 : i32
    %c0_i32_1 = arith.constant 0 : i32
    return %c0_i32, %c0_i32_0 : i32, i32
  }
  func.func @transform_20(%arg0: i32) -> (i32, i32) {
    %c0_i32 = arith.constant 0 : i32
    %c0_i32_0 = arith.constant 0 : i32
    %c0_i32_1 = arith.constant 0 : i32
    return %c0_i32, %c0_i32_0 : i32, i32
  }
  func.func @transform_21(%arg0: i32) -> (i32, i32) {
    %c0_i32 = arith.constant 0 : i32
    %c0_i32_0 = arith.constant 0 : i32
    %c0_i32_1 = arith.constant 0 : i32
    return %c0_i32, %c0_i32_0 : i32, i32
  }
}

</mosaic_0001>

<bundles_post_ra>
// kernel: tpu_custom_call.1
= control target key start
LH: loop header
LB: loop body
LE: loop exit
PB: predicated region body
PF: predicated region fallthrough
CT: control target
= control target key end

     0   :  { %s2827_s0 = inlined_call_operand.vmem [shape: f32[16,32], index: 0, kind: input, shape index: {}]   ;;  %s2828_s1 = inlined_call_operand.vmem [shape: f32[16,32], index: 1, kind: input, shape index: {}]   ;;  %s2829_s2 = inlined_call_operand.vmem [shape: f32[16,32], index: 2, kind: input, shape index: {}]   ;;  %s2830_s3 = inlined_call_operand.vmem [shape: bf16[32,256], index: 3, kind: input, shape index: {}]   ;;  %s2831_s4 = inlined_call_operand.vmem [shape: f32[1,256], index: 4, kind: input, shape index: {}]   ;;  %s2832_s5 = inlined_call_operand.vmem [shape: bf16[256,64], index: 5, kind: input, shape index: {}]   ;;  %s2833_s6 = inlined_call_operand.vmem [shape: f32[1,64], index: 6, kind: input, shape index: {}]   ;;  %s2834_s7 = inlined_call_operand.vmem [shape: bf16[32,256], index: 7, kind: input, shape index: {}]   ;;  %s2835_s8 = inlined_call_operand.vmem [shape: f32[1,256], index: 8, kind: input, shape index: {}]   ;;  %s2836_s9 = inlined_call_operand.vmem [shape: bf16[256,64], index: 9, kind: input, shape index: {}]   ;;  %s2837_s10 = inlined_call_operand.vmem [shape: f32[1,64], index: 10, kind: input, shape index: {}]   ;;  %s2838_s11 = inlined_call_operand.vmem [shape: bf16[32,256], index: 11, kind: input, shape index: {}]   ;;  %s2839_s12 = inlined_call_operand.vmem [shape: f32[1,256], index: 12, kind: input, shape index: {}]   ;;  %s2840_s13 = inlined_call_operand.vmem [shape: bf16[256,64], index: 13, kind: input, shape index: {}]   ;;  %s2841_s14 = inlined_call_operand.vmem [shape: f32[1,64], index: 14, kind: input, shape index: {}]   ;;  %s2842_s15 = inlined_call_operand.vmem [shape: bf16[64,32], index: 15, kind: input, shape index: {}]   ;;  %s2843_s16 = inlined_call_operand.vmem [shape: f32[1,32], index: 16, kind: input, shape index: {}]   ;;  %s2844_s17 = inlined_call_operand.vmem [shape: bf16[32,64], index: 17, kind: input, shape index: {}]   ;;  %s2845_s18 = inlined_call_operand.vmem [shape: f32[1,64], index: 18, kind: input, shape index: {}]   ;;  %s2846_s19 = inlined_call_operand.vmem [shape: bf16[64,32], index: 19, kind: input, shape index: {}]   ;;  %s2847_s20 = inlined_call_operand.vmem [shape: f32[1,32], index: 20, kind: input, shape index: {}]   ;;  %s2848_s21 = inlined_call_operand.hbm [shape: f32[8,64], index: 21, kind: output, shape index: {}]  }
   0x1   :  { %2854 = sst [smem:[#allocation8_spill]] %s2827_s0 }
   0x2   :  { %2855 = sst [smem:[#allocation9_spill]] %s2828_s1 }
   0x3   :  { %2856 = sst [smem:[#allocation10_spill]] %s2829_s2 }
   0x4   :  { %2857 = sst [smem:[#allocation11_spill]] %s2830_s3 }
   0x5   :  { %2858 = sst [smem:[#allocation12_spill]] %s2831_s4 }
   0x6   :  { %2859 = sst [smem:[#allocation13_spill]] %s2832_s5 }
   0x7   :  { %s2860_s26 = sld [smem:[#allocation11_spill]]  ;;  %v2291_v2 = vmov 0   ;;  %v2175_v7 = vld [vmem:[%s2834_s7 + $0x14] ss:$8 sps:$4 sm:$0xff]   ;;  %v2173_v9 = vld [vmem:[%s2834_s7 + $0x10] ss:$8 sps:$4 sm:$0xff]  }
   0x8   :  { %145 = vmatprep.mubr.bf16.mxu0 %v2291_v2  ;;  %s2861_s22 = sld [smem:[#allocation8_spill]]  ;;  %v2178_v10 = vld [vmem:[%s2834_s7 + $0x4] ss:$8 sps:$4 sm:$0xff]   ;;  %vm109_vm0 = vcmask 261120   ;;  %v2176_v13 = vld [vmem:[%s2834_s7] ss:$8 sps:$4 sm:$0xff]  }
   0x9   :  { %s2862_s0 = sld [smem:[#allocation13_spill]]  ;;  %v2184_v19 = vld [vmem:[%s2836_s9 + $0x78] sm:$0xff]   ;;  %v2188_v24 = vld [vmem:[%s2836_s9 + $0x70] sm:$0xff]   ;;  %v2192_v28 = vld [vmem:[%s2836_s9 + $0x68] sm:$0xff]  }
   0xa   :  { %s2863_s24 = sld [smem:[#allocation9_spill]]  ;;  %v2186_v22 = vld [vmem:[%s2836_s9 + $0x38] sm:$0xff]   ;;  %v2190_v26 = vld [vmem:[%s2836_s9 + $0x30] sm:$0xff]   ;;  %v2194_v30 = vld [vmem:[%s2836_s9 + $0x28] sm:$0xff]  }
   0xd   :  { %v2167_v0 = vld [vmem:[%s2860_s26 + $0x14] ss:$8 sps:$4 sm:$0xff]   ;;  %v2169_v1 = vld [vmem:[%s2860_s26 + $0x10] ss:$8 sps:$4 sm:$0xff]   ;;  %v2170_v3 = vld [vmem:[%s2860_s26 + $0x4] ss:$8 sps:$4 sm:$0xff]  }
   0xe   :  { %125 = vmatprep.subr.bf16.mxu0 %v2167_v0  ;;  %v2172_v4 = vld [vmem:[%s2860_s26] ss:$8 sps:$4 sm:$0xff]  }
   0xf   :  { %v70_v5 = vld [vmem:[%s2861_s22] sm:$0xff]  ;;  %126 = vmatpush1.bf16.msra.mxu0 %v2169_v1  ;;  %v71_v6 = vld [vmem:[%s2861_s22 + $0x8] sm:$0xff]  ;;  %v2179_v11 = vld [vmem:[%s2862_s0 + $0x78] sm:$0xff]  }
  0x10   :  { %127 = vmatprep.subr.bf16.mxu0 %v2170_v3  ;;  %v72_v8 = vpack.c.bf16 %v71_v6, %v70_v5  ;;  %v2180_v12 = vld [vmem:[%s2862_s0 + $0x38] sm:$0xff]   ;;  %v341_v14 = vld [vmem:[%s2863_s24] sm:$0xff]  ;;  %v342_v15 = vld [vmem:[%s2863_s24 + $0x8] sm:$0xff]  ;;  %1941 = vmatprep.subr.bf16.mxu1 %v2179_v11 }
  0x11   :  { %v2181_v16 = vld [vmem:[%s2862_s0 + $0x70] sm:$0xff]   ;;  %1942 = vmatpush3.bf16.msra.mxu1 %v2180_v12  ;;  %v2183_v18 = vld [vmem:[%s2862_s0 + $0x68] sm:$0xff]   ;;  %v343_v21 = vpack.c.bf16 %v342_v15, %v341_v14  ;;  %v2187_v23 = vld [vmem:[%s2862_s0 + $0x60] sm:$0xff]  }
  0x12   :  { %v2182_v17 = vld [vmem:[%s2862_s0 + $0x30] sm:$0xff]   ;;  %1943 = vmatprep.subr.bf16.mxu1 %v2181_v16  ;;  %v2185_v20 = vld [vmem:[%s2862_s0 + $0x28] sm:$0xff]   ;;  %v2189_v25 = vld [vmem:[%s2862_s0 + $0x20] sm:$0xff]  }
  0x13   :  { %128 = vmatpush1.bf16.msra.mxu0 %v2172_v4  ;;  %v2191_v27 = vld [vmem:[%s2862_s0 + $0x58] sm:$0xff]  }
  0x14   :  { %395 = vmatprep.subr.bf16.mxu0 %v2175_v7  ;;  %v2193_v29 = vld [vmem:[%s2862_s0 + $0x18] sm:$0xff]  }
  0x15   :  { %1944 = vmatpush3.bf16.msra.mxu1 %v2182_v17 }
  0x16   :  { %1839 = vmatmul.mubr.msk.bf16.vlgmr.msra.gmra.mxu0 %vm109_vm0, %v72_v8  ;;  %1945 = vmatprep.subr.bf16.mxu1 %v2183_v18 }
  0x17   :  { %396 = vmatpush1.bf16.msra.mxu0 %v2173_v9  ;;  %415 = vmatprep.mubr.bf16.mxu0 %v2291_v2 }
  0x18   :  { %397 = vmatprep.subr.bf16.mxu0 %v2178_v10 }
  0x19   :  { %1946 = vmatpush3.bf16.msra.mxu1 %v2185_v20 }
  0x1a   :  { %1947 = vmatprep.subr.bf16.mxu1 %v2187_v23 }
  0x1b   :  { %398 = vmatpush1.bf16.msra.mxu0 %v2176_v13 }
  0x1c   :  { %1963 = vmatprep.subr.bf16.mxu0 %v2184_v19 }
  0x1d   :  { %1948 = vmatpush3.bf16.msra.mxu1 %v2189_v25 }
  0x1e   :  { %1861 = vmatmul.mubr.msk.bf16.vlgmr.msra.gmra.mxu0 %vm109_vm0, %v343_v21  ;;  %1949 = vmatprep.subr.bf16.mxu1 %v2191_v27 }
  0x1f   :  { %1964 = vmatpush3.bf16.msra.mxu0 %v2186_v22 }
  0x20   :  { %1965 = vmatprep.subr.bf16.mxu0 %v2188_v24 }
  0x21   :  { %1950 = vmatpush3.bf16.msra.mxu1 %v2193_v29 }
  0x23   :  { %1966 = vmatpush3.bf16.msra.mxu0 %v2190_v26 }
  0x24   :  { %1967 = vmatprep.subr.bf16.mxu0 %v2192_v28 }
  0x27   :  { %1968 = vmatpush3.bf16.msra.mxu0 %v2194_v30 }
  0x28   :  { %26 = vsyncpa [#allocation6], 0  ;;  %v2195_v31 = vld [vmem:[%s2862_s0 + $0x50] sm:$0xff]   ;;  %v2196_v32 = vld [vmem:[%s2836_s9 + $0x60] sm:$0xff]   ;;  %v79_v48 = vlaneseq  ;;  %s2864_s28 = sld [smem:[#allocation12_spill]]  ;;  %vm2293_vm1 = vmmov 0  }
  0x29   :  { %v2197_v33 = vld [vmem:[%s2862_s0 + $0x10] sm:$0xff]   ;;  %v2198_v34 = vld [vmem:[%s2836_s9 + $0x20] sm:$0xff]   ;;  %1951 = vmatprep.subr.bf16.mxu1 %v2195_v31  ;;  %1969 = vmatprep.subr.bf16.mxu0 %v2196_v32  ;;  %v2199_v35 = vld [vmem:[%s2862_s0 + $0x48] sm:$0xff]   ;;  %vm338_vm2 = vcmask 523264   ;;  %s2294_s23 = smov 96   ;;  %vm931_vm3 = vcmask 64512  }
  0x2a   :  { %1952 = vmatpush3.bf16.msra.mxu1 %v2197_v33  ;;  %v2200_v36 = vld [vmem:[%s2836_s9 + $0x58] sm:$0xff]   ;;  %v2201_v37 = vld [vmem:[%s2862_s0 + $0x8] sm:$0xff]   ;;  %v2203_v39 = vld [vmem:[%s2862_s0 + $0x40] sm:$0xff]   ;;  %v80_v49 = vshrl.u32 %v79_v48, 7  ;;  %vm942_vm4 = vcmask 1043456   ;;  %vm1819_vm7 = vcmask 523520  }
  0x2b   :  { %1970 = vmatpush3.bf16.msra.mxu0 %v2198_v34  ;;  %v2202_v38 = vld [vmem:[%s2836_s9 + $0x18] sm:$0xff]   ;;  %1953 = vmatprep.subr.bf16.mxu1 %v2199_v35  ;;  %v2204_v40 = vld [vmem:[%s2836_s9 + $0x50] sm:$0xff]   ;;  %v2205_v41 = vld [vmem:[%s2862_s0] sm:$0xff]   ;;  %s2865_s0 = sld [smem:[#allocation10_spill]] }
  0x2c   :  { %1971 = vmatprep.subr.bf16.mxu0 %v2200_v36  ;;  %v2206_v42 = vld [vmem:[%s2836_s9 + $0x10] sm:$0xff]   ;;  %v2207_v43 = vld [vmem:[%s2836_s9 + $0x48] sm:$0xff]   ;;  %v2209_v45 = vld [vmem:[%s2836_s9 + $0x40] sm:$0xff]   ;;  %v2546_v50 = vsub.s32 1, %v80_v49  ;;  %v2548_v51 = vsub.s32 0, %v80_v49 }
  0x2d   :  { %v2208_v44 = vld [vmem:[%s2836_s9 + $0x8] sm:$0xff]   ;;  %v2210_v46 = vld [vmem:[%s2836_s9] sm:$0xff]   ;;  %v2213_v47 = vld [vmem:[%s2838_s11 + $0x14] ss:$8 sps:$4 sm:$0xff]  }
  0x2e   :  { %1954 = vmatpush3.bf16.msra.mxu1 %v2201_v37  ;;  %v77_v52 = vld [vmem:[%s2864_s28] sm:$0x3]  ;;  %v2211_v10 = vld [vmem:[%s2838_s11 + $0x10] ss:$8 sps:$4 sm:$0xff]   ;;  %v2216_v13 = vld [vmem:[%s2838_s11 + $0x4] ss:$8 sps:$4 sm:$0xff]  }
  0x2f   :  { %1972 = vmatpush3.bf16.msra.mxu0 %v2202_v38  ;;  %1955 = vmatprep.subr.bf16.mxu1 %v2203_v39  ;;  %v86_v54 = vrot.slane %v77_v52, %v2546_v50  ;;  %v82_v55 = vrot.slane %v77_v52, %v2548_v51  ;;  %v348_v63 = vld [vmem:[%s2835_s8] sm:$0x3]  ;;  %v2217_v29 = vld [vmem:[%s2840_s13 + $0x78] sm:$0xff]   ;;  %v2219_v31 = vld [vmem:[%s2840_s13 + $0x70] sm:$0xff]   ;;  %s2295_s28 = smov 32  }
  0x30   :  { %1973 = vmatprep.subr.bf16.mxu0 %v2204_v40  ;;  %v357_v5 = vrot.slane %v348_v63, %v2546_v50  ;;  %v353_v7 = vrot.slane %v348_v63, %v2548_v51  ;;  %v2214_v19 = vld [vmem:[%s2838_s11] ss:$8 sps:$4 sm:$0xff]   ;;  %v2218_v30 = vld [vmem:[%s2840_s13 + $0x38] sm:$0xff]   ;;  %v2220_v32 = vld [vmem:[%s2840_s13 + $0x30] sm:$0xff]  }
  0x31   :  { %v610_v20 = vld [vmem:[%s2865_s0] sm:$0xff]  ;;  %v611_v21 = vld [vmem:[%s2865_s0 + $0x8] sm:$0xff]  ;;  %v2226_v52 = vld [vmem:[%s2840_s13 + $0x18] sm:$0xff]  }
  0x32   :  { %1956 = vmatpush3.bf16.msra.mxu1 %v2205_v41  ;;  %v612_v26 = vpack.c.bf16 %v611_v21, %v610_v20  ;;  %v2221_v33 = vld [vmem:[%s2840_s13 + $0x68] sm:$0xff]   ;;  %v2223_v35 = vld [vmem:[%s2840_s13 + $0x60] sm:$0xff]   ;;  %v2228_v63 = vld [vmem:[%s2840_s13 + $0x10] sm:$0xff]  }
  0x33   :  { %1974 = vmatpush3.bf16.msra.mxu0 %v2206_v42  ;;  %664 = vmatprep.subr.bf16.mxu1 %v2213_v47  ;;  %v2222_v34 = vld [vmem:[%s2840_s13 + $0x28] sm:$0xff]   ;;  %v1840_v37 = vld [vmem:[%s2833_s6] ss:$0 sm:$0xff] }
  0x34   :  { %1975 = vmatprep.subr.bf16.mxu0 %v2207_v43  ;;  %v617_v47 = vld [vmem:[%s2839_s12] sm:$0x3] }
  0x37   :  { %1976 = vmatpush3.bf16.msra.mxu0 %v2208_v44  ;;  %v2224_v44 = vld [vmem:[%s2840_s13 + $0x20] sm:$0xff]  }
  0x38   :  { %1977 = vmatprep.subr.bf16.mxu0 %v2209_v45  ;;  %v2225_v45 = vld [vmem:[%s2840_s13 + $0x58] sm:$0xff]  }
  0x3b   :  { %1978 = vmatpush3.bf16.msra.mxu0 %v2210_v46 }
  0xd6   :  { %v147_v53 = vpop.f32.mrf.mxu0 }
  0xd7   :  { %v148_v60 = vadd.f32 %v147_v53, %v82_v55  ;;  %v626_v53 = vrot.slane %v617_v47, %v2546_v50 }
  0xd8   :  { %v149_v56 = vpop.f32.mrf.mxu0 }
  0xd9   :  { %v150_v58 = vadd.f32 %v149_v56, %v86_v54  ;;  %v156_v6 = vmax.f32 %v148_v60, 0.0 }
  0xda   :  { %v151_v57 = vpop.f32.mrf.mxu0 }
  0xdb   :  { %v152_v59 = vadd.f32 %v151_v57, %v82_v55  ;;  %v157_v3 = vmax.f32 %v150_v58, 0.0  ;;  %v2227_v57 = vld [vmem:[%s2840_s13 + $0x50] sm:$0xff]  }
  0xdc   :  { %v153_v61 = vpop.f32.mrf.mxu0 }
  0xdd   :  { %v154_v62 = vadd.f32 %v153_v61, %v86_v54  ;;  %v158_v0 = vmax.f32 %v152_v59, 0.0  ;;  %v1862_v54 = vld [vmem:[%s2837_s10] ss:$0 sm:$0xff]  ;;  %v622_v61 = vrot.slane %v617_v47, %v2548_v51 }
  0xde   :  { %v417_v1 = vpop.f32.mrf.mxu0 }
  0xdf   :  { %v159_v4 = vmax.f32 %v154_v62, 0.0  ;;  %v160_v11 = vpack.c.bf16 %v158_v0, %v156_v6  ;;  %v418_v16 = vadd.f32 %v417_v1, %v353_v7 }
  0xe0   :  { %v419_v8 = vpop.f32.mrf.mxu0 }
  0xe1   :  { %v161_v9 = vpack.c.bf16 %v159_v4, %v157_v3  ;;  %v420_v14 = vadd.f32 %v419_v8, %v357_v5  ;;  %v426_v25 = vmax.f32 %v418_v16, 0.0  ;;  %v2229_v3 = vld [vmem:[%s2840_s13 + $0x48] sm:$0xff]  }
  0xe2   :  { %v421_v12 = vpop.f32.mrf.mxu0 }
  0xe3   :  { %v422_v15 = vadd.f32 %v421_v12, %v353_v7  ;;  %329 = vmatprep.mubr.bf16.mxu1 %v161_v9  ;;  %v427_v23 = vmax.f32 %v420_v14, 0.0  ;;  %v2231_v12 = vld [vmem:[%s2840_s13 + $0x40] sm:$0xff]  }
  0xe4   :  { %330 = vmatmul.mubr.bf16.vlgmr.msra.gmra.mxu1 %v160_v11  ;;  %v423_v17 = vpop.f32.mrf.mxu0 }
  0xe5   :  { %v424_v18 = vadd.f32 %v423_v17, %v357_v5  ;;  %665 = vmatpush1.bf16.msra.mxu1 %v2211_v10  ;;  %684 = vmatprep.mubr.bf16.mxu1 %v2291_v2  ;;  %v428_v22 = vmax.f32 %v422_v15, 0.0  ;;  %v2292_v2 = vmov 0.0   ;;  %v2230_v10 = vld [vmem:[%s2840_s13 + $0x8] sm:$0xff]   ;;  %v2232_v17 = vld [vmem:[%s2840_s13] sm:$0xff]  }
  0xe6   :  { %666 = vmatprep.subr.bf16.mxu1 %v2216_v13  ;;  %2049 = vmatprep.subr.bf16.mxu0 %v2292_v2 }
  0xe7   :  { %v429_v24 = vmax.f32 %v424_v18, 0.0  ;;  %v430_v28 = vpack.c.bf16 %v428_v22, %v426_v25 }
  0xe9   :  { %v431_v27 = vpack.c.bf16 %v429_v24, %v427_v23  ;;  %667 = vmatpush1.bf16.msra.mxu1 %v2214_v19  ;;  %v1884_v23 = vld [vmem:[%s2841_s14] ss:$0 sm:$0xff] }
  0xea   :  { %1985 = vmatprep.subr.bf16.mxu1 %v2217_v29 }
  0xeb   :  { %599 = vmatprep.mubr.bf16.mxu0 %v431_v27 }
  0xec   :  { %600 = vmatmul.mubr.bf16.vlgmr.msra.gmra.mxu0 %v430_v28  ;;  %1883 = vmatmul.mubr.msk.bf16.vlgmr.msra.gmra.mxu1 %vm109_vm0, %v612_v26 }
  0xed   :  { %2051 = vmatprep.mubr.msk.bf16.mxu0 %vm2293_vm1, %v2292_v2  ;;  %1986 = vmatpush3.bf16.msra.mxu1 %v2218_v30 }
  0xee   :  { %1987 = vmatprep.subr.bf16.mxu1 %v2219_v31 }
  0xf1   :  { %1988 = vmatpush3.bf16.msra.mxu1 %v2220_v32 }
  0xf2   :  { %1989 = vmatprep.subr.bf16.mxu1 %v2221_v33 }
  0xf5   :  { %1990 = vmatpush3.bf16.msra.mxu1 %v2222_v34 }
  0xf6   :  { %1991 = vmatprep.subr.bf16.mxu1 %v2223_v35 }
  0xf9   :  { %1992 = vmatpush3.bf16.msra.mxu1 %v2224_v44 }
  0xfa   :  { %1993 = vmatprep.subr.bf16.mxu1 %v2225_v45 }
  0xfd   :  { %1994 = vmatpush3.bf16.msra.mxu1 %v2226_v52 }
  0xfe   :  { %1995 = vmatprep.subr.bf16.mxu1 %v2227_v57 }
 0x101   :  { %1996 = vmatpush3.bf16.msra.mxu1 %v2228_v63 }
 0x102   :  { %1997 = vmatprep.subr.bf16.mxu1 %v2229_v3 }
 0x105   :  { %1998 = vmatpush3.bf16.msra.mxu1 %v2230_v10 }
 0x106   :  { %1999 = vmatprep.subr.bf16.mxu1 %v2231_v12 }
 0x109   :  { %2000 = vmatpush3.bf16.msra.mxu1 %v2232_v17 }
 0x10a   :  { %2073 = vmatprep.subr.bf16.mxu1 %v2292_v2 }
 0x1a4   :  { %v1957_v36 = vpop.f32.mrf.mxu1 }
 0x1a6   :  { %v1958_v38 = vpop.f32.mrf.mxu1 }
 0x1a7   :  { %v1959_v39 = vadd.f32 %v1958_v38, %v1957_v36 }
 0x1a8   :  { %v1960_v40 = vpop.f32.mrf.mxu1 }
 0x1a9   :  { %v332_v41 = vadd.f32 %v1959_v39, %v1840_v37 }
 0x1aa   :  { %v1961_v42 = vpop.f32.mrf.mxu1 }
 0x1ab   :  { %339 = vst.msk [vmem:[#allocation2] sm:$0xff] %vm338_vm2, %v332_v41  ;;  %v1962_v43 = vadd.f32 %v1961_v42, %v1960_v40 }
 0x1ac   :  { %v1979_v46 = vpop.f32.mrf.mxu0  ;;  %v686_v48 = vpop.f32.mrf.mxu1 }
 0x1ad   :  { %v335_v49 = vadd.f32 %v1962_v43, %v1840_v37  ;;  %v687_v51 = vadd.f32 %v686_v48, %v622_v61 }
 0x1ae   :  { %v1980_v55 = vpop.f32.mrf.mxu0  ;;  %v688_v56 = vpop.f32.mrf.mxu1 }
 0x1af   :  { %340 = vst.msk [vmem:[#allocation2 + $0x8] sm:$0xff] %vm338_vm2, %v335_v49  ;;  %v1981_v58 = vadd.f32 %v1980_v55, %v1979_v46  ;;  %v689_v59 = vadd.f32 %v688_v56, %v626_v53  ;;  %v695_v15 = vmax.f32 %v687_v51, 0.0  ;;  %v2235_v51 = vld [vmem:[%s2842_s15 + $0x8] sm:$0xff]  }
 0x1b0   :  { %v1982_v60 = vpop.f32.mrf.mxu0  ;;  %v690_v62 = vpop.f32.mrf.mxu1 }
 0x1b1   :  { %v602_v50 = vadd.f32 %v1981_v58, %v1862_v54  ;;  %v696_v5 = vmax.f32 %v689_v59, 0.0  ;;  %v691_v7 = vadd.f32 %v690_v62, %v622_v61 }
 0x1b2   :  { %v1983_v0 = vpop.f32.mrf.mxu0  ;;  %v692_v1 = vpop.f32.mrf.mxu1 }
 0x1b3   :  { %608 = vst.msk [vmem:[#allocation3] sm:$0xff] %vm338_vm2, %v602_v50  ;;  %v1984_v4 = vadd.f32 %v1983_v0, %v1982_v60  ;;  %v693_v6 = vadd.f32 %v692_v1, %v626_v53  ;;  %v697_v16 = vmax.f32 %v691_v7, 0.0  ;;  %v2236_v7 = vld [vmem:[%s2842_s15] sm:$0xff]  }
 0x1b5   :  { %v605_v8 = vadd.f32 %v1984_v4, %v1862_v54  ;;  %v698_v9 = vmax.f32 %v693_v6, 0.0  ;;  %v699_v18 = vpack.c.bf16 %v697_v16, %v695_v15  ;;  %v2234_v6 = vld [vmem:[%s2842_s15 + $0x10] sm:$0xff]  }
 0x1b6   :  { %v879_v11 = vld [vmem:[#allocation2] ss:$2 sm:$0xff]  ;;  %v1348_v15 = vld [vmem:[#allocation2 + $0x1] ss:$2 sm:$0xff] }
 0x1b7   :  { %609 = vst.msk [vmem:[#allocation3 + $0x8] sm:$0xff] %vm338_vm2, %v605_v8  ;;  %v880_v13 = vpack.c.bf16 %v879_v11, %v879_v11  ;;  %v700_v14 = vpack.c.bf16 %v698_v9, %v696_v5  ;;  %v2233_v5 = vld [vmem:[%s2842_s15 + $0x18] sm:$0xff]   ;;  %v1349_v17 = vpack.c.bf16 %v1348_v15, %v1348_v15 }
 0x1b9   :  { %993 = vrot.lane.b32.xlu1 %v880_v13, %s2294_s23  ;;  %868 = vmatprep.mubr.bf16.mxu1 %v700_v14 }
 0x1ba   :  { %869 = vmatmul.mubr.bf16.vlgmr.msra.gmra.mxu1 %v699_v18 }
 0x1bb   :  { %2081 = vmatprep.mubr.msk.bf16.mxu1 %vm2293_vm1, %v2292_v2  ;;  %2074 = vmatpush3.bf16.msra.mxu1 %v2233_v5 }
 0x1bc   :  { %2075 = vmatprep.subr.bf16.mxu1 %v2292_v2 }
 0x1be   :  { %v881_v19 = vld [vmem:[#allocation3] ss:$2 sm:$0xff]  ;;  %v1351_v3 = vld [vmem:[#allocation3 + $0x1] ss:$2 sm:$0xff] }
 0x1bf   :  { %v882_v20 = vpack.c.bf16 %v881_v19, %v881_v19  ;;  %v1352_v4 = vpack.c.bf16 %v1351_v3, %v1351_v3  ;;  %2076 = vmatpush3.bf16.msra.mxu1 %v2234_v6 }
 0x1c0   :  { %2077 = vmatprep.subr.bf16.mxu1 %v2292_v2 }
 0x1c1   :  { %v889_v21 = vsel %vm109_vm0, %v882_v20, 0 }
 0x1c2   :  { %2050 = vmatpush3.bf16.xpose.msra.mxu0 %v889_v21 }
 0x1c3   :  { %2055 = vmatprep.subr.bf16.mxu0 %v2292_v2  ;;  %2078 = vmatpush3.bf16.msra.mxu1 %v2235_v51  ;;  %v2765_v51 = vld [vmem:[%s2847_s20] ss:$0 sm:$0xff] }
 0x1c4   :  { %2079 = vmatprep.subr.bf16.mxu1 %v2292_v2 }
 0x1c7   :  { %2080 = vmatpush3.bf16.msra.mxu1 %v2236_v7 }
 0x1c8   :  { %2105 = vmatprep.subr.bf16.mxu1 %v2292_v2 }
 0x1c9   :  { %2052 = vmatmul.mubr.msk.bf16.vlgmr.msra.gmra.mxu0 %vm109_vm0, %v880_v13 }
 0x1ca   :  { %2057 = vmatprep.mubr.msk.bf16.mxu0 %vm2293_vm1, %v2292_v2 }
 0x22b   :  { %v994_v48 = vpop.permute.xlu1 %993 }
 0x27a   :  { %v2001_v22 = vpop.f32.mrf.mxu1 }
 0x27c   :  { %v2002_v24 = vpop.f32.mrf.mxu1 }
 0x27d   :  { %v2003_v25 = vadd.f32 %v2002_v24, %v2001_v22  ;;  %v1360_v24 = vsel %vm109_vm0, %v1352_v4, 0 }
 0x27e   :  { %v2004_v26 = vpop.f32.mrf.mxu1 }
 0x27f   :  { %v871_v27 = vadd.f32 %v2003_v25, %v1884_v23 }
 0x280   :  { %v2005_v28 = vpop.f32.mrf.mxu1 }
 0x281   :  { %877 = vst.msk [vmem:[#allocation4] sm:$0xff] %vm338_vm2, %v871_v27  ;;  %v2006_v29 = vadd.f32 %v2005_v28, %v2004_v26  ;;  %v2237_v28 = vld [vmem:[%s2844_s17 + $0x8] sm:$0xff]  }
 0x283   :  { %v874_v31 = vadd.f32 %v2006_v29, %v1884_v23  ;;  %v2238_v29 = vld [vmem:[%s2844_s17] sm:$0xff]  }
 0x285   :  { %878 = vst.msk [vmem:[#allocation4 + $0x8] sm:$0xff] %vm338_vm2, %v874_v31 }
 0x289   :  { %v925_v30 = vpop.f32.mrf.mxu0 }
 0x28a   :  { %v932_v32 = vsel %vm931_vm3, %v925_v30, -inf }
 0x28b   :  { %933 = vmax.xlane.f32.xlu0 %v932_v32  ;;  %v2053_v33 = vpop.f32.mrf.mxu0 }
 0x28c   :  { %v883_v36 = vld [vmem:[#allocation4] ss:$2 sm:$0xff]  ;;  %v1354_v25 = vld [vmem:[#allocation4 + $0x1] ss:$2 sm:$0xff] }
 0x28d   :  { %v928_v34 = vpop.f32.mrf.mxu0  ;;  %v884_v37 = vpack.c.bf16 %v883_v36, %v883_v36  ;;  %v1355_v26 = vpack.c.bf16 %v1354_v25, %v1354_v25  ;;  %v2244_v25 = vld [vmem:[%s2842_s15 + $0x10] sm:$0xff]  }
 0x28f   :  { %v2054_v35 = vpop.f32.mrf.mxu0  ;;  %v944_v38 = vsel %vm942_vm4, %v884_v37, 0  ;;  %v1413_v27 = vsel %vm942_vm4, %v1355_v26, 0 }
 0x290   :  { %2056 = vmatpush3.bf16.msra.mxu0 %v944_v38 }
 0x291   :  { %2061 = vmatprep.subr.bf16.mxu0 %v2292_v2 }
 0x2a1   :  { %996 = vrot.lane.b32.xlu0 %v882_v20, %s2294_s23 }
 0x2a5   :  { %1052 = vrot.lane.b32.xlu0 %v884_v37, %s2294_s23 }
 0x314   :  { %v934_v39 = vpop.xlane.xlu0 %933 }
 0x315   :  { %v935_v40 = vsub.f32 %v925_v30, %v934_v39  ;;  %v2719_v30 = vld [vmem:[%s2843_s16] ss:$0 sm:$0xff] }
 0x317   :  { %v936_v41 = vmul.f32 1.442695, %v935_v40 }
 0x318   :  { %v997_v43 = vpop.permute.xlu0 %996 }
 0x319   :  { %2253 = vpow2.f32 %v936_v41  ;;  %v1002_v45 = vsel %vm109_vm0, %v997_v43, 0  ;;  %v2239_v43 = vld [vmem:[%s2846_s19 + $0x18] sm:$0xff]  }
 0x31c   :  { %v1053_v46 = vpop.permute.xlu0 %1052 }
 0x31d   :  { %v1058_v47 = vsel %vm942_vm4, %v1053_v46, 0  ;;  %v2242_v46 = vld [vmem:[%s2846_s19] sm:$0xff]  }
 0x326   :  { %v2254_v42 = vpop.eup %2253 }
 0x327   :  { %v938_v44 = vpack.c.bf16 %v2254_v42, %v2254_v42  ;;  %v986_v59 = vsel %vm931_vm3, %v2254_v42, 0.0 }
 0x329   :  { %2058 = vmatmul.mubr.msk.bf16.vlgmr.msra.gmra.mxu0 %vm931_vm3, %v938_v44  ;;  %v2240_v44 = vld [vmem:[%s2846_s19 + $0x10] sm:$0xff]  }
 0x32a   :  { %2062 = vmatpush3.bf16.xpose.msra.mxu0 %v1002_v45  ;;  %2063 = vmatprep.mubr.msk.bf16.mxu0 %vm2293_vm1, %v2292_v2  ;;  %v2241_v45 = vld [vmem:[%s2846_s19 + $0x8] sm:$0xff]  }
 0x32b   :  { %2067 = vmatprep.subr.bf16.mxu0 %v2292_v2 }
 0x331   :  { %2064 = vmatmul.mubr.msk.bf16.vlgmr.msra.gmra.mxu0 %vm109_vm0, %v994_v48 }
 0x332   :  { %2068 = vmatpush3.bf16.msra.mxu0 %v1058_v47  ;;  %2069 = vmatprep.mubr.msk.bf16.mxu0 %vm2293_vm1, %v2292_v2 }
 0x333   :  { %2085 = vmatprep.subr.bf16.mxu0 %v2292_v2 }
 0x3e9   :  { %v980_v49 = vpop.f32.mrf.mxu0 }
 0x3eb   :  { %v2059_v52 = vpop.f32.mrf.mxu0 }
 0x3ed   :  { %v983_v53 = vpop.f32.mrf.mxu0 }
 0x3ef   :  { %v2060_v54 = vpop.f32.mrf.mxu0 }
 0x3f1   :  { %v1038_v55 = vpop.f32.mrf.mxu0 }
 0x3f2   :  { %v1044_v56 = vsel %vm931_vm3, %v1038_v55, -inf }
 0x3f3   :  { %1045 = vmax.xlane.f32.xlu1 %v1044_v56  ;;  %v2065_v57 = vpop.f32.mrf.mxu0 }
 0x3f4   :  { %v2751_v57 = vld [vmem:[%s2845_s18] ss:$0 sm:$0xff] }
 0x3f5   :  { %v1041_v58 = vpop.f32.mrf.mxu0 }
 0x3f7   :  { %987 = vadd.xlane.f32.xlu1 %v986_v59  ;;  %v2066_v60 = vpop.f32.mrf.mxu0 }
 0x47c   :  { %v1046_v61 = vpop.xlane.xlu1 %1045 }
 0x47d   :  { %v1047_v62 = vsub.f32 %v1038_v55, %v1046_v61 }
 0x47f   :  { %v1048_v50 = vmul.f32 1.442695, %v1047_v62 }
 0x480   :  { %v988_v18 = vpop.xlane.xlu1 %987 }
 0x481   :  { %2255 = vpow2.f32 %v1048_v50 }
 0x48e   :  { %v2256_v63 = vpop.eup %2255 }
 0x48f   :  { %v1100_v0 = vsel %vm931_vm3, %v2256_v63, 0.0  ;;  %v1050_v1 = vpack.c.bf16 %v2256_v63, %v2256_v63 }
 0x490   :  { %1101 = vadd.xlane.f32.xlu0 %v1100_v0 }
 0x491   :  { %2070 = vmatmul.mubr.msk.bf16.vlgmr.msra.gmra.mxu0 %vm931_vm3, %v1050_v1 }
 0x492   :  { %2089 = vmatprep.mubr.msk.bf16.mxu0 %vm2293_vm1, %v2292_v2  ;;  %2086 = vmatpush3.bf16.msra.mxu0 %v2237_v28 }
 0x493   :  { %2087 = vmatprep.subr.bf16.mxu0 %v2292_v2 }
 0x496   :  { %2088 = vmatpush3.bf16.msra.mxu0 %v2238_v29 }
 0x497   :  { %2093 = vmatprep.subr.bf16.mxu0 %v2292_v2 }
 0x4a6   :  { %1465 = vrot.lane.b32.xlu0 %v1352_v4, %s2294_s23 }
 0x519   :  { %v1102_v8 = vpop.xlane.xlu0 %1101 }
 0x51a   :  { %2257 = vrcp.f32 %v1102_v8 }
 0x51b   :  { %2259 = vrcp.f32 %v988_v18 }
 0x51d   :  { %v1466_v62 = vpop.permute.xlu0 %1465 }
 0x51e   :  { %v1471_v1 = vsel %vm109_vm0, %v1466_v62, 0 }
 0x527   :  { %v2258_v9 = vpop.eup %2257 }
 0x528   :  { %v2260_v19 = vpop.eup %2259 }
 0x529   :  { %v990_v20 = vmul.f32 %v2260_v19, %v980_v49 }
 0x52b   :  { %v991_v21 = vpack.c.bf16 %v990_v20, %v990_v20 }
 0x551   :  { %v1094_v10 = vpop.f32.mrf.mxu0 }
 0x552   :  { %v1104_v11 = vmul.f32 %v2258_v9, %v1094_v10 }
 0x553   :  { %v2071_v12 = vpop.f32.mrf.mxu0 }
 0x554   :  { %v1105_v13 = vpack.c.bf16 %v1104_v11, %v1104_v11 }
 0x555   :  { %v1097_v14 = vpop.f32.mrf.mxu0 }
 0x556   :  { %1107 = vrot.lane.b32.xlu1 %v1105_v13, %s2295_s28 }
 0x557   :  { %v2072_v16 = vpop.f32.mrf.mxu0 }
 0x55a   :  { %1462 = vrot.lane.b32.xlu1 %v1349_v17, %s2294_s23 }
 0x5c8   :  { %v1108_v22 = vpop.permute.xlu1 %1107 }
 0x5c9   :  { %v1111_v23 = vsel %vm109_vm0, %v991_v21, %v1108_v22 }
 0x5ca   :  { %2082 = vmatmul.mubr.msk.bf16.vlgmr.msra.gmra.mxu1 %vm338_vm2, %v1111_v23 }
 0x5cb   :  { %2106 = vmatpush3.bf16.xpose.msra.mxu1 %v1360_v24  ;;  %2107 = vmatprep.mubr.msk.bf16.mxu1 %vm2293_vm1, %v2292_v2  ;;  %v2243_v24 = vld [vmem:[%s2842_s15 + $0x18] sm:$0xff]  }
 0x5cc   :  { %2111 = vmatprep.subr.bf16.mxu1 %v2292_v2  ;;  %v1463_v47 = vpop.permute.xlu1 %1462 }
 0x5d2   :  { %2108 = vmatmul.mubr.msk.bf16.vlgmr.msra.gmra.mxu1 %vm109_vm0, %v1349_v17 }
 0x5d3   :  { %2112 = vmatpush3.bf16.msra.mxu1 %v1413_v27  ;;  %2113 = vmatprep.mubr.msk.bf16.mxu1 %vm2293_vm1, %v2292_v2  ;;  %v2246_v27 = vld [vmem:[%s2842_s15] sm:$0xff]  }
 0x5d4   :  { %2123 = vmatprep.subr.bf16.mxu1 %v2292_v2 }
 0x68a   :  { %v1187_v31 = vpop.f32.mrf.mxu1 }
 0x68b   :  { %v1188_v32 = vadd.f32 %v2719_v30, %v1187_v31 }
 0x68c   :  { %v2083_v33 = vpop.f32.mrf.mxu1 }
 0x68d   :  { %vm1193_vm5 = vcmp.ne.f32.partialorder %v1188_v32, %v1188_v32 }
 0x68e   :  { %v1194_v34 = vsel %vm1193_vm5, 0.0, %v1188_v32  ;;  %v1190_v35 = vpop.f32.mrf.mxu1 }
 0x68f   :  { %v1195_v36 = vpack.c.bf16 %v1194_v34, %v1194_v34 }
 0x690   :  { %v2084_v37 = vpop.f32.mrf.mxu1 }
 0x691   :  { %2090 = vmatmul.mubr.msk.bf16.vlgmr.msra.gmra.mxu0 %vm109_vm0, %v1195_v36 }
 0x692   :  { %v1396_v38 = vpop.f32.mrf.mxu1  ;;  %2101 = vmatprep.mubr.msk.bf16.mxu0 %vm2293_vm1, %v2292_v2  ;;  %2094 = vmatpush3.bf16.msra.mxu0 %v2239_v43  ;;  %v2247_v43 = vld [vmem:[%s2844_s17 + $0x8] sm:$0xff]  }
 0x693   :  { %v1402_v39 = vsel %vm931_vm3, %v1396_v38, -inf  ;;  %2095 = vmatprep.subr.bf16.mxu0 %v2292_v2 }
 0x694   :  { %1403 = vmax.xlane.f32.xlu1 %v1402_v39  ;;  %v2109_v40 = vpop.f32.mrf.mxu1 }
 0x696   :  { %v1399_v41 = vpop.f32.mrf.mxu1  ;;  %2096 = vmatpush3.bf16.msra.mxu0 %v2240_v44  ;;  %v2248_v44 = vld [vmem:[%s2844_s17] sm:$0xff]  }
 0x697   :  { %2097 = vmatprep.subr.bf16.mxu0 %v2292_v2 }
 0x698   :  { %v2110_v42 = vpop.f32.mrf.mxu1 }
 0x69a   :  { %2098 = vmatpush3.bf16.msra.mxu0 %v2241_v45 }
 0x69b   :  { %2099 = vmatprep.subr.bf16.mxu0 %v2292_v2 }
 0x69e   :  { %2100 = vmatpush3.bf16.msra.mxu0 %v2242_v46 }
 0x69f   :  { %2117 = vmatprep.subr.bf16.mxu0 %v2292_v2 }
 0x6a5   :  { %1521 = vrot.lane.b32.xlu1 %v1355_v26, %s2294_s23  ;;  %v2245_v26 = vld [vmem:[%s2842_s15 + $0x8] sm:$0xff]  }
 0x71d   :  { %v1404_v48 = vpop.xlane.xlu1 %1403 }
 0x71e   :  { %v1405_v49 = vsub.f32 %v1396_v38, %v1404_v48 }
 0x720   :  { %v1406_v52 = vmul.f32 1.442695, %v1405_v49 }
 0x721   :  { %v1522_v54 = vpop.permute.xlu1 %1521 }
 0x722   :  { %2261 = vpow2.f32 %v1406_v52  ;;  %v1527_v56 = vsel %vm942_vm4, %v1522_v54, 0  ;;  %v2249_v52 = vld [vmem:[%s2846_s19 + $0x18] sm:$0xff]  }
 0x72f   :  { %v2262_v53 = vpop.eup %2261 }
 0x730   :  { %v1408_v55 = vpack.c.bf16 %v2262_v53, %v2262_v53  ;;  %v1455_v23 = vsel %vm931_vm3, %v2262_v53, 0.0 }
 0x732   :  { %2114 = vmatmul.mubr.msk.bf16.vlgmr.msra.gmra.mxu1 %vm931_vm3, %v1408_v55  ;;  %v2250_v55 = vld [vmem:[%s2846_s19 + $0x10] sm:$0xff]  }
 0x733   :  { %2124 = vmatpush3.bf16.msra.mxu1 %v1527_v56  ;;  %2125 = vmatprep.mubr.msk.bf16.mxu1 %vm2293_vm1, %v2292_v2  ;;  %v2252_v56 = vld [vmem:[%s2846_s19] sm:$0xff]  }
 0x734   :  { %2141 = vmatprep.subr.bf16.mxu1 %v2292_v2 }
 0x751   :  { %v1256_v58 = vpop.f32.mrf.mxu0 }
 0x752   :  { %v1257_v59 = vadd.f32 %v2751_v57, %v1256_v58 }
 0x753   :  { %v2091_v60 = vpop.f32.mrf.mxu0 }
 0x754   :  { %v1262_v61 = vmax.f32 %v1257_v59, 0.0 }
 0x755   :  { %v1259_v50 = vpop.f32.mrf.mxu0 }
 0x756   :  { %v1263_v63 = vpack.c.bf16 %v1262_v61, %v1262_v61 }
 0x757   :  { %v2092_v0 = vpop.f32.mrf.mxu0 }
 0x758   :  { %2102 = vmatmul.mubr.msk.bf16.vlgmr.msra.gmra.mxu0 %vm338_vm2, %v1263_v63 }
 0x759   :  { %2118 = vmatpush3.bf16.xpose.msra.mxu0 %v1471_v1  ;;  %2119 = vmatprep.mubr.msk.bf16.mxu0 %vm2293_vm1, %v2292_v2 }
 0x75a   :  { %2129 = vmatprep.subr.bf16.mxu0 %v2292_v2 }
 0x760   :  { %2120 = vmatmul.mubr.msk.bf16.vlgmr.msra.gmra.mxu0 %vm109_vm0, %v1463_v47 }
 0x761   :  { %2137 = vmatprep.mubr.msk.bf16.mxu0 %vm2293_vm1, %v2292_v2  ;;  %2130 = vmatpush3.bf16.msra.mxu0 %v2243_v24 }
 0x762   :  { %2131 = vmatprep.subr.bf16.mxu0 %v2292_v2 }
 0x765   :  { %2132 = vmatpush3.bf16.msra.mxu0 %v2244_v25 }
 0x766   :  { %2133 = vmatprep.subr.bf16.mxu0 %v2292_v2 }
 0x769   :  { %2134 = vmatpush3.bf16.msra.mxu0 %v2245_v26 }
 0x76a   :  { %2135 = vmatprep.subr.bf16.mxu0 %v2292_v2 }
 0x76d   :  { %2136 = vmatpush3.bf16.msra.mxu0 %v2246_v27 }
 0x7f2   :  { %v1449_v3 = vpop.f32.mrf.mxu1 }
 0x7f4   :  { %v2115_v4 = vpop.f32.mrf.mxu1 }
 0x7f6   :  { %v1452_v5 = vpop.f32.mrf.mxu1 }
 0x7f8   :  { %v2116_v6 = vpop.f32.mrf.mxu1 }
 0x818   :  { %v1340_v7 = vpop.f32.mrf.mxu0 }
 0x819   :  { %v1341_v8 = vadd.f32 %v2765_v51, %v1340_v7 }
 0x81a   :  { %v2103_v9 = vpop.f32.mrf.mxu0 }
 0x81b   :  { %1346 = vst.msk [vmem:[#allocation5] sm:$0xff] %vm109_vm0, %v1341_v8 }
 0x81c   :  { %v1343_v10 = vpop.f32.mrf.mxu0 }
 0x81e   :  { %v2104_v11 = vpop.f32.mrf.mxu0 }
 0x820   :  { %v1507_v12 = vpop.f32.mrf.mxu0 }
 0x821   :  { %v1513_v13 = vsel %vm931_vm3, %v1507_v12, -inf }
 0x822   :  { %1514 = vmax.xlane.f32.xlu0 %v1513_v13  ;;  %v2121_v14 = vpop.f32.mrf.mxu0 }
 0x824   :  { %v1510_v15 = vpop.f32.mrf.mxu0 }
 0x826   :  { %v2122_v16 = vpop.f32.mrf.mxu0 }
 0x8ab   :  { %v1515_v17 = vpop.xlane.xlu0 %1514 }
 0x8ac   :  { %v1516_v18 = vsub.f32 %v1507_v12, %v1515_v17 }
 0x8ae   :  { %v1517_v19 = vmul.f32 1.442695, %v1516_v18 }
 0x8b0   :  { %2263 = vpow2.f32 %v1517_v19 }
 0x8bd   :  { %v2264_v20 = vpop.eup %2263 }
 0x8be   :  { %v1569_v21 = vsel %vm931_vm3, %v2264_v20, 0.0  ;;  %v1519_v22 = vpack.c.bf16 %v2264_v20, %v2264_v20 }
 0x8bf   :  { %1570 = vadd.xlane.f32.xlu0 %v1569_v21 }
 0x8c0   :  { %2126 = vmatmul.mubr.msk.bf16.vlgmr.msra.gmra.mxu1 %vm931_vm3, %v1519_v22 }
 0x8c1   :  { %2145 = vmatprep.mubr.msk.bf16.mxu1 %vm2293_vm1, %v2292_v2  ;;  %2142 = vmatpush3.bf16.msra.mxu1 %v2247_v43 }
 0x8c2   :  { %2143 = vmatprep.subr.bf16.mxu1 %v2292_v2 }
 0x8c3   :  { %1456 = vadd.xlane.f32.xlu0 %v1455_v23 }
 0x8c5   :  { %2144 = vmatpush3.bf16.msra.mxu1 %v2248_v44 }
 0x8c6   :  { %2149 = vmatprep.subr.bf16.mxu1 %v2292_v2 }
 0x948   :  { %v1571_v28 = vpop.xlane.xlu0 %1570 }
 0x949   :  { %2265 = vrcp.f32 %v1571_v28 }
 0x94c   :  { %v1457_v37 = vpop.xlane.xlu0 %1456 }
 0x94d   :  { %2267 = vrcp.f32 %v1457_v37 }
 0x956   :  { %v2266_v29 = vpop.eup %2265 }
 0x95a   :  { %v2268_v38 = vpop.eup %2267 }
 0x95b   :  { %v1459_v39 = vmul.f32 %v2268_v38, %v1449_v3 }
 0x95d   :  { %v1460_v40 = vpack.c.bf16 %v1459_v39, %v1459_v39 }
 0x980   :  { %v1563_v31 = vpop.f32.mrf.mxu1 }
 0x981   :  { %v1573_v32 = vmul.f32 %v2266_v29, %v1563_v31 }
 0x982   :  { %v2127_v33 = vpop.f32.mrf.mxu1 }
 0x983   :  { %v1574_v34 = vpack.c.bf16 %v1573_v32, %v1573_v32 }
 0x984   :  { %v1566_v35 = vpop.f32.mrf.mxu1 }
 0x985   :  { %1576 = vrot.lane.b32.xlu1 %v1574_v34, %s2295_s28 }
 0x986   :  { %v2128_v36 = vpop.f32.mrf.mxu1 }
 0x9f7   :  { %v1577_v41 = vpop.permute.xlu1 %1576 }
 0x9f8   :  { %v1580_v42 = vsel %vm109_vm0, %v1460_v40, %v1577_v41 }
 0x9f9   :  { %2138 = vmatmul.mubr.msk.bf16.vlgmr.msra.gmra.mxu0 %vm338_vm2, %v1580_v42 }
 0xab9   :  { %v1656_v45 = vpop.f32.mrf.mxu0 }
 0xaba   :  { %v1657_v46 = vadd.f32 %v2719_v30, %v1656_v45  ;;  %v2251_v30 = vld [vmem:[%s2846_s19 + $0x8] sm:$0xff]   ;;  %s2296_s19 = smov [#allocation5]  }
 0xabb   :  { %v2139_v47 = vpop.f32.mrf.mxu0  ;;  %s1827_s22 = sshll.u32 %s2296_s19, 4  ;;  %s1828_s22 = int_to_ptr.vmem [resolvable:$true] %s1827_s22 }
 0xabc   :  { %vm1662_vm6 = vcmp.ne.f32.partialorder %v1657_v46, %v1657_v46  ;;  %s2269_s1 = scalar_lea.vmem %s1828_s22, 128  ;;  %p2274_p1 = scmp.lt.s32.totalorder %s1828_s22, %s1828_s22 }
 0xabd   :  { %v1663_v48 = vsel %vm1662_vm6, 0.0, %v1657_v46  ;;  %v1659_v49 = vpop.f32.mrf.mxu0  ;;  %p2270_p0 = scmp.ne.s32.totalorder %s1828_s22, %s2269_s1  ;;  %p2275_p2 = scmp.lt.s32.totalorder %s2269_s1, %s2269_s1 }
 0xabe   :  { %v1664_v53 = vpack.c.bf16 %v1663_v48, %v1663_v48 }
 0xabf   :  { %v2140_v54 = vpop.f32.mrf.mxu0  ;;  %p2276_p3 = por %p2275_p2, %p2274_p1 }
 0xac0   :  { %2146 = vmatmul.mubr.msk.bf16.vlgmr.msra.gmra.mxu1 %vm109_vm0, %v1664_v53 }
 0xac1   :  { %2150 = vmatpush3.bf16.msra.mxu1 %v2249_v52  ;;  %2157 = vmatprep.mubr.msk.bf16.mxu1 %vm2293_vm1, %v2292_v2  ;;  %p2277_p4 = pnand %p2276_p3, %p2270_p0 }
 0xac2   :  { %2151 = vmatprep.subr.bf16.mxu1 %v2292_v2 }
 0xac5   :  { %2152 = vmatpush3.bf16.msra.mxu1 %v2250_v55 }
 0xac6   :  { %2153 = vmatprep.subr.bf16.mxu1 %v2292_v2 }
 0xac9   :  { %2154 = vmatpush3.bf16.msra.mxu1 %v2251_v30 }
 0xaca   :  { %2155 = vmatprep.subr.bf16.mxu1 %v2292_v2 }
 0xacd   :  { %2156 = vmatpush3.bf16.msra.mxu1 %v2252_v56 }
 0xb80   :  { %v1725_v58 = vpop.f32.mrf.mxu1 }
 0xb81   :  { %v1726_v59 = vadd.f32 %v2751_v57, %v1725_v58 }
 0xb82   :  { %v2147_v60 = vpop.f32.mrf.mxu1 }
 0xb83   :  { %v1731_v61 = vmax.f32 %v1726_v59, 0.0 }
 0xb84   :  { %v1728_v62 = vpop.f32.mrf.mxu1 }
 0xb85   :  { %v1732_v50 = vpack.c.bf16 %v1731_v61, %v1731_v61 }
 0xb86   :  { %v2148_v63 = vpop.f32.mrf.mxu1 }
 0xb87   :  { %2158 = vmatmul.mubr.msk.bf16.vlgmr.msra.gmra.mxu1 %vm338_vm2, %v1732_v50 }
 0xc47   :  { %v1809_v0 = vpop.f32.mrf.mxu1 }
 0xc48   :  { %v1810_v1 = vadd.f32 %v2765_v51, %v1809_v0 }
 0xc49   :  { %v2159_v3 = vpop.f32.mrf.mxu1 }
 0xc4a   :  { %1816 = vrot.lane.b32.xlu0 %v1810_v1, %s2295_s28 }
 0xc4b   :  { %v1812_v2 = vpop.f32.mrf.mxu1 }
 0xc4d   :  { %v2160_v4 = vpop.f32.mrf.mxu1 }
 0xcbc   :  { %v1817_v57 = vpop.permute.xlu0 %1816 }
 0xcbd   :  { %1820 = vst.msk [vmem:[#allocation5] sm:$0xff] %vm1819_vm7, %v1817_v57 }
 0xcbe   :  { %2280 = shalt.err (!%p2277_p4)
}
 0xcbf   :  { %1830 = dma.vmem_to_hbm [thread:$0]  %s1828_s22, 128, %s2848_s21, [#allocation6]  }
 0xcc0   :  { %2289 = dma.done.wait [#allocation6], 128  }
 0xcc1   :  { %2290 = vsyncadd [#allocation6], 4294967168 }
 0xcc2   :  { %1834 = vsyncpa [#allocation6], 1 }

</bundles_post_ra>
